<compile_context>
chip_gen: v7x
topology: tpu7x:2x2x1
jax: 0.10.0
libtpu: 0.0.40
codegen_flags: <defaults>
</compile_context>

<pallas_src>
import jax
import jax.numpy as jnp
from jax.experimental import pallas as pl
from jax.experimental.pallas import tpu as pltpu


def _round_up(x, m):
    return ((x + m - 1) // m) * m


def _sigmoid(z):
    # EUP-only epilogue: exp + approx reciprocal (both transcendental slot).
    return pl.reciprocal(1.0 + jnp.exp(-z), approx=True)


def _autoencoder_kernel(x_ref, wg_ref, bg_ref, wh_ref, bh_ref, out_ref):
    # x_ref : [TB, Q] f32     wg_ref : [Q, K] bf16 (pre-transposed in wrapper)
    # bg_ref: [1, K]  f32     wh_ref : [K, Q] bf16 (pre-transposed in wrapper)
    # bh_ref: [1, Q]  f32     out_ref: [TB, Q] f32
    x = x_ref[...].astype(jnp.bfloat16)          # cheap VPU cast, hidden behind MXU

    # ---- layer g: sigmoid(x @ Wg^T + bg) ---------------------------------
    z1 = jnp.dot(x, wg_ref[...], preferred_element_type=jnp.float32)
    h1 = _sigmoid(z1 + bg_ref[...])              # f32 epilogue, [TB, K]

    # ---- layer h: sigmoid(h1 @ Wh^T + bh) --------------------------------
    z2 = jnp.dot(h1.astype(jnp.bfloat16), wh_ref[...],
                 preferred_element_type=jnp.float32)
    out_ref[...] = _sigmoid(z2 + bh_ref[...]).astype(out_ref.dtype)


def autoencoder_forward(x, g_weight, g_bias, h_weight, h_bias, *, block_b=1024):
    """Forward pass of the AutoEncoder.

    x        : [B, Q]  float32 user vectors
    g_weight : [K, Q]  (PyTorch nn.Linear layout: [out, in])
    g_bias   : [K]
    h_weight : [Q, K]
    h_bias   : [Q]
    returns  : [B, Q]  float32
    """
    B, Q = x.shape
    K = g_weight.shape[0]

    # Batch tile: as large as block_b allows (amortize ~0.35us/step pipeline
    # overhead), multiple of 16 (bf16 packing), split in two so the grid has
    # >=2 steps where possible (megacore on v7x; harmless on v5e/v6e).
    TB = min(block_b, max(16, _round_up(pl.cdiv(B, 2), 16)))
    grid = (pl.cdiv(B, TB),)

    # One-time weight prep (128-256 KiB): transpose to MXU-native [K,N] layout
    # and cast to bf16 so the resident VMEM copy is half-size and no per-step
    # relayout/cast is paid inside the grid loop.
    wg_t = jnp.transpose(g_weight).astype(jnp.bfloat16)   # [Q, K]
    wh_t = jnp.transpose(h_weight).astype(jnp.bfloat16)   # [K, Q]
    bg = g_bias.reshape(1, K).astype(jnp.float32)
    bh = h_bias.reshape(1, Q).astype(jnp.float32)

    # Advisory cost for the XLA scheduler.
    cost = pl.CostEstimate(
        flops=int(4 * B * Q * K),                       # two matmuls
        transcendentals=int(2 * B * (K + Q)),           # exp + reciprocal
        bytes_accessed=int(4 * 2 * B * Q + 2 * 2 * Q * K + 4 * (K + Q)),
    )

    return pl.pallas_call(
        _autoencoder_kernel,
        out_shape=jax.ShapeDtypeStruct((B, Q), jnp.float32),
        grid=grid,
        in_specs=[
            pl.BlockSpec((TB, Q), lambda i: (i, 0)),   # x : streamed per step
            pl.BlockSpec((Q, K), lambda i: (0, 0)),    # Wg^T: VMEM-resident
            pl.BlockSpec((1, K), lambda i: (0, 0)),    # bg : resident
            pl.BlockSpec((K, Q), lambda i: (0, 0)),    # Wh^T: VMEM-resident
            pl.BlockSpec((1, Q), lambda i: (0, 0)),    # bh : resident
        ],
        out_specs=pl.BlockSpec((TB, Q), lambda i: (i, 0)),
        compiler_params=pltpu.CompilerParams(
            dimension_semantics=("parallel",)),        # batch axis -> 2 TCs on v7x
        cost_estimate=cost,
    )(x.astype(jnp.float32), wg_t, bg, wh_t, bh)


# ----------------------------- test harness --------------------------------

def _reference(x, g_w, g_b, h_w, h_b):
    return jax.nn.sigmoid(jax.nn.sigmoid(x @ g_w.T + g_b) @ h_w.T + h_b)


def _init_linear(key, out_features, in_features):
    """Deterministic init matching nn.Linear's uniform(-1/sqrt(in), 1/sqrt(in))."""
    kw, kb = jax.random.split(key)
    bound = 1.0 / jnp.sqrt(jnp.float32(in_features))
    w = jax.random.uniform(kw, (out_features, in_features), jnp.float32,
                           minval=-bound, maxval=bound)
    b = jax.random.uniform(kb, (out_features,), jnp.float32,
                           minval=-bound, maxval=bound)
    return w, b


if __name__ == "__main__":
    NUM_QUESTION, K = 256, 128

    root = jax.random.PRNGKey(0)
    k_x1, k_x2, k_g, k_h = jax.random.split(root, 4)

    g_w, g_b = _init_linear(k_g, K, NUM_QUESTION)      # g: Q -> K
    h_w, h_b = _init_linear(k_h, NUM_QUESTION, K)      # h: K -> Q

    # bf16 MXU + approx-reciprocal sigmoid vs. f32 reference: loose-ish tol.
    ATOL = 2e-2

    # Case 1: even batch -> TB=256, grid=2 (both v7x TensorCores active).
    B1 = 512
    x1 = jax.random.uniform(k_x1, (B1, NUM_QUESTION), jnp.float32)
    out1 = jax.block_until_ready(autoencoder_forward(x1, g_w, g_b, h_w, h_b))
    ref1 = _reference(x1, g_w, g_b, h_w, h_b)
    assert out1.shape == (B1, NUM_QUESTION)
    assert out1.dtype == jnp.float32
    assert jnp.allclose(out1, ref1, atol=ATOL, rtol=ATOL), \
        float(jnp.max(jnp.abs(out1 - ref1)))

    # Case 2: ragged batch -> TB=64, grid=2, partial last block masked by Pallas
    # (no jnp.pad / slicing in the wrapper).
    B2 = 100
    x2 = jax.random.uniform(k_x2, (B2, NUM_QUESTION), jnp.float32)
    out2 = jax.block_until_ready(autoencoder_forward(x2, g_w, g_b, h_w, h_b))
    ref2 = _reference(x2, g_w, g_b, h_w, h_b)
    assert out2.shape == (B2, NUM_QUESTION)
    assert jnp.allclose(out2, ref2, atol=ATOL, rtol=ATOL), \
        float(jnp.max(jnp.abs(out2 - ref2)))

    print("KERNEL_OK")
</pallas_src>

<mosaic_0001>
module attributes {stable_mosaic.version = 11 : i64} {
  func.func @_autoencoder_kernel(%arg0: i32, %arg1: memref<256x256xf32, #tpu.memory_space<vmem>>, %arg2: memref<256x128xbf16, #tpu.memory_space<vmem>>, %arg3: memref<1x128xf32, #tpu.memory_space<vmem>>, %arg4: memref<128x256xbf16, #tpu.memory_space<vmem>>, %arg5: memref<1x256xf32, #tpu.memory_space<vmem>>, %arg6: memref<256x256xf32, #tpu.memory_space<vmem>>) attributes {dimension_semantics = [#tpu.dimension_semantics<parallel>], iteration_bounds = array<i64: 2>, scalar_prefetch = 0 : i64, scratch_operands = 0 : i64, tpu.core_type = #tpu.core_type<tc>, window_params = [{transform_indices = @transform_0, window_bounds = array<i64: 256, 256>}, {pipeline_mode = #tpu.pipeline_mode<synchronous>, transform_indices = @transform_1, window_bounds = array<i64: 256, 128>}, {pipeline_mode = #tpu.pipeline_mode<synchronous>, transform_indices = @transform_2, window_bounds = array<i64: 1, 128>}, {pipeline_mode = #tpu.pipeline_mode<synchronous>, transform_indices = @transform_3, window_bounds = array<i64: 128, 256>}, {pipeline_mode = #tpu.pipeline_mode<synchronous>, transform_indices = @transform_4, window_bounds = array<i64: 1, 256>}, {transform_indices = @transform_5, window_bounds = array<i64: 256, 256>}]} {
    %c0 = arith.constant 0 : index
    %c0_0 = arith.constant 0 : index
    %0 = vector.load %arg1[%c0, %c0_0] : memref<256x256xf32, #tpu.memory_space<vmem>>, vector<256x256xf32>
    %1 = arith.truncf %0 : vector<256x256xf32> to vector<256x256xbf16>
    %c0_1 = arith.constant 0 : index
    %c0_2 = arith.constant 0 : index
    %2 = vector.load %arg2[%c0_1, %c0_2] : memref<256x128xbf16, #tpu.memory_space<vmem>>, vector<256x128xbf16>
    %cst = arith.constant dense<0.000000e+00> : vector<256x128xf32>
    %3 = tpu.matmul %1, %2, %cst {dimension_numbers = #tpu.dot_dimension_numbers<[1], [0], [0], [1], [0, 0, 1, 1], [], []>} : vector<256x256xbf16>, vector<256x128xbf16>, vector<256x128xf32> -> vector<256x128xf32>
    %c0_3 = arith.constant 0 : index
    %c0_4 = arith.constant 0 : index
    %4 = vector.load %arg3[%c0_3, %c0_4] : memref<1x128xf32, #tpu.memory_space<vmem>>, vector<1x128xf32>
    %5 = vector.broadcast %4 : vector<1x128xf32> to vector<256x128xf32>
    %6 = arith.addf %3, %5 : vector<256x128xf32>
    %cst_5 = arith.constant 0.000000e+00 : f32
    %7 = vector.broadcast %cst_5 : f32 to vector<256x128xf32>
    %8 = arith.subf %7, %6 : vector<256x128xf32>
    %9 = math.exp %8 : vector<256x128xf32>
    %cst_6 = arith.constant 1.000000e+00 : f32
    %10 = vector.broadcast %cst_6 : f32 to vector<256x128xf32>
    %11 = arith.addf %10, %9 : vector<256x128xf32>
    %12 = tpu.reciprocal %11 {approx = true} : vector<256x128xf32> -> vector<256x128xf32>
    %13 = arith.truncf %12 : vector<256x128xf32> to vector<256x128xbf16>
    %c0_7 = arith.constant 0 : index
    %c0_8 = arith.constant 0 : index
    %14 = vector.load %arg4[%c0_7, %c0_8] : memref<128x256xbf16, #tpu.memory_space<vmem>>, vector<128x256xbf16>
    %cst_9 = arith.constant dense<0.000000e+00> : vector<256x256xf32>
    %15 = tpu.matmul %13, %14, %cst_9 {dimension_numbers = #tpu.dot_dimension_numbers<[1], [0], [0], [1], [0, 0, 1, 1], [], []>} : vector<256x128xbf16>, vector<128x256xbf16>, vector<256x256xf32> -> vector<256x256xf32>
    %c0_10 = arith.constant 0 : index
    %c0_11 = arith.constant 0 : index
    %16 = vector.load %arg5[%c0_10, %c0_11] : memref<1x256xf32, #tpu.memory_space<vmem>>, vector<1x256xf32>
    %17 = vector.broadcast %16 : vector<1x256xf32> to vector<256x256xf32>
    %18 = arith.addf %15, %17 : vector<256x256xf32>
    %cst_12 = arith.constant 0.000000e+00 : f32
    %19 = vector.broadcast %cst_12 : f32 to vector<256x256xf32>
    %20 = arith.subf %19, %18 : vector<256x256xf32>
    %21 = math.exp %20 : vector<256x256xf32>
    %cst_13 = arith.constant 1.000000e+00 : f32
    %22 = vector.broadcast %cst_13 : f32 to vector<256x256xf32>
    %23 = arith.addf %22, %21 : vector<256x256xf32>
    %24 = tpu.reciprocal %23 {approx = true} : vector<256x256xf32> -> vector<256x256xf32>
    %c0_14 = arith.constant 0 : index
    %c0_15 = arith.constant 0 : index
    %25 = vector.load %arg6[%c0_14, %c0_15] : memref<256x256xf32, #tpu.memory_space<vmem>>, vector<256x256xf32>
    tpu.vector_store %arg6[%c0_14, %c0_15], %24 {strides = array<i32>} : memref<256x256xf32, #tpu.memory_space<vmem>>, vector<256x256xf32>,
    return
  }
  func.func @transform_0(%arg0: i32) -> (i32, i32) {
    %c0_i32 = arith.constant 0 : i32
    %c0_i32_0 = arith.constant 0 : i32
    return %arg0, %c0_i32 : i32, i32
  }
  func.func @transform_1(%arg0: i32) -> (i32, i32) {
    %c0_i32 = arith.constant 0 : i32
    %c0_i32_0 = arith.constant 0 : i32
    %c0_i32_1 = arith.constant 0 : i32
    return %c0_i32, %c0_i32_0 : i32, i32
  }
  func.func @transform_2(%arg0: i32) -> (i32, i32) {
    %c0_i32 = arith.constant 0 : i32
    %c0_i32_0 = arith.constant 0 : i32
    %c0_i32_1 = arith.constant 0 : i32
    return %c0_i32, %c0_i32_0 : i32, i32
  }
  func.func @transform_3(%arg0: i32) -> (i32, i32) {
    %c0_i32 = arith.constant 0 : i32
    %c0_i32_0 = arith.constant 0 : i32
    %c0_i32_1 = arith.constant 0 : i32
    return %c0_i32, %c0_i32_0 : i32, i32
  }
  func.func @transform_4(%arg0: i32) -> (i32, i32) {
    %c0_i32 = arith.constant 0 : i32
    %c0_i32_0 = arith.constant 0 : i32
    %c0_i32_1 = arith.constant 0 : i32
    return %c0_i32, %c0_i32_0 : i32, i32
  }
  func.func @transform_5(%arg0: i32) -> (i32, i32) {
    %c0_i32 = arith.constant 0 : i32
    %c0_i32_0 = arith.constant 0 : i32
    return %arg0, %c0_i32 : i32, i32
  }
}

</mosaic_0001>

<bundles_post_ra>
// kernel: tpu_custom_call.1
= control target key start
LH: loop header
LB: loop body
LE: loop exit
PB: predicated region body
PF: predicated region fallthrough
CT: control target
= control target key end

     0   :  { %10 = vsyncpa [#allocation3], 0  ;;  %s3001_s0 = inlined_call_operand.hbm [shape: f32[512,256], index: 0, kind: input, shape index: {}]   ;;  %s3002_s1 = inlined_call_operand.hbm [shape: bf16[256,128], index: 1, kind: input, shape index: {}]   ;;  %s3003_s2 = inlined_call_operand.vmem [shape: f32[1,128], index: 2, kind: input, shape index: {}]   ;;  %s3004_s3 = inlined_call_operand.hbm [shape: bf16[128,256], index: 3, kind: input, shape index: {}]   ;;  %s3005_s4 = inlined_call_operand.vmem [shape: f32[1,256], index: 4, kind: input, shape index: {}]   ;;  %s3006_s5 = inlined_call_operand.hbm [shape: f32[512,256], index: 5, kind: output, shape index: {}]  }
   0x1   :  { %12 = vsyncpa [#allocation3 + $0x1], 0 }
   0x2   :  { %13 = vsyncpa [#allocation6], 0 }
   0x3   :  { %14 = vsyncpa [#allocation4], 0 }
   0x4   :  { %16 = vsyncpa [#allocation4 + $0x1], 0  ;;  %s2506_s18 = smov 0   ;;  %s2508_s19 = smov 0  }
   0x5   :  { %s2510_s20 = smov 0   ;;  %s2512_s21 = smov 0  }
   0x6 LB: > { %s2527_s22 = sadd.s32 4294967295, %s2461_s21   ;;  %s1636_s23 = sadd.s32 4294967294, %s2461_s21   ;;  %s2461_s21 = sphi %s2512_s21, %s3026_s21   ;;  %s2457_s20 = sphi %s2510_s20, %s3025_s20   ;;  %s2453_s19 = sphi %s2508_s19, %s3024_s19   ;;  %s2449_s18 = sphi %s2506_s18, %s3023_s18  }
   0x7   : > { %p42_p0 = scmp.ne.s32.totalorder %s2453_s19, %s2449_s18  ;;  %p3007_p1 = scmp.eq.s32.totalorder %s2527_s22, 0 }
   0x8   : > { %p156_p3 = scmp.eq.s32.totalorder %s1636_s23, 1  ;;  %p1637_p5 = scmp.ge.s32.totalorder %s2461_s21, 1 }
   0x9   : > { %p2536_p4 = por %p3007_p1, %p42_p0  ;;  %p163_p7 = scmp.lt.s32.totalorder %s2461_s21, 3 }
   0xa   : > { %p2541_p6 = por %p156_p3, %p42_p0  ;;  %s2463_s27 = smov [#allocation5]  }
   0xb   : > { %s3010_s24 = scalar_select %p2536_p4, 1, 0 }
   0xc   : > { %s3011_s25 = scalar_select %p2541_p6, 1, 0 }
   0xd   : > { %p2546_p8 = pnand %p1637_p5, %p163_p7  ;;  %s175_s28 = sshll.u32 %s2463_s27, 4  ;;  %s2550_s28 = int_to_ptr.vmem [resolvable:$true] %s175_s28 }
   0xe   : > { %s2464_s30 = smov [#allocation7]   ;;  %s2305_s9 = scalar_lea.hbm %s3002_s1, 2048 }
   0xf   : > { %p1817_p9 = pneg %p2546_p8  ;;  %s191_s6 = sshll.u32 %s2464_s30, 4  ;;  %s2561_s6 = int_to_ptr.vmem [resolvable:$true] %s191_s6 }
  0x10   : > { %p2306_p12 = scmp.ne.s32.totalorder %s3002_s1, %s2305_s9  ;;  %p2312_p5 = scmp.lt.u32.totalorder %s2305_s9, %s3002_s1 }
  0x11   : > { %p2557_p11 = pnand %p1817_p9, %p3007_p1 }
  0x13   : > { %p2307_p13 = pneg %p2557_p11 }
  0x15   : > { %p2308_p0 = pnand %p2307_p13, %p2306_p12 }
  0x17   : > { %p2309_p3 = pneg %p2308_p0 }
  0x19   : > { %p2314_p7 = pnand %p2312_p5, %p2309_p3 }
  0x1b   : > { %2317 = shalt.err (!%p2314_p7)
}
  0x1c   : > { %s2318_s14 = scalar_lea.vmem %s2550_s28, 2048  ;;  %p2326_p2 = scmp.lt.s32.totalorder %s2550_s28, %s2550_s28 }
  0x1d   : > { %p2319_p9 = scmp.ne.s32.totalorder %s2550_s28, %s2318_s14  ;;  %p2327_p12 = scmp.lt.s32.totalorder %s2318_s14, %s2318_s14 }
  0x1f   : > { %p2321_p10 = pnand %p2319_p9, %p2307_p13  ;;  %p2328_p0 = por %p2327_p12, %p2326_p2 }
  0x21   : > { %p2322_p1 = pneg %p2321_p10 }
  0x23   : > { %p2329_p6 = pnand %p2328_p0, %p2322_p1 }
  0x25   : > { %2332 = shalt.err (!%p2329_p6)
}
  0x26   : > { %s2465_s15 = smov 64   ;;  %s2466_s16 = smov 4  }
  0x27   : > { %1820 = dma.hbm_to_vmem [thread:$0]  (!%p2557_p11), %s3002_s1, 2048, %s2550_s28, [#allocation6], %s2465_s15, %s2465_s15, %s2466_s16  }
  0x28   : > { %s2333_s7 = scalar_lea.hbm %s3004_s3, 2048 }
  0x29   : > { %p2334_p2 = scmp.ne.s32.totalorder %s3004_s3, %s2333_s7  ;;  %p2340_p10 = scmp.lt.u32.totalorder %s2333_s7, %s3004_s3 }
  0x2b   : > { %p2336_p1 = pnand %p2334_p2, %p2307_p13 }
  0x2d   : > { %p2337_p6 = pneg %p2336_p1 }
  0x2f   : > { %p2342_p3 = pnand %p2340_p10, %p2337_p6 }
  0x31   : > { %2345 = shalt.err (!%p2342_p3)
}
  0x32   : > { %s2346_s28 = scalar_lea.vmem %s2561_s6, 2048  ;;  %p2354_p12 = scmp.lt.s32.totalorder %s2561_s6, %s2561_s6 }
  0x33   : > { %p2347_p5 = scmp.ne.s32.totalorder %s2561_s6, %s2346_s28  ;;  %p2355_p0 = scmp.lt.s32.totalorder %s2346_s28, %s2346_s28 }
  0x35   : > { %p2349_p7 = pnand %p2347_p5, %p2307_p13  ;;  %p2356_p2 = por %p2355_p0, %p2354_p12 }
  0x37   : > { %p2350_p9 = pneg %p2349_p7 }
  0x39   : > { %p2357_p1 = pnand %p2356_p2, %p2350_p9 }
  0x3b   : > { %2360 = shalt.err (!%p2357_p1)
}
  0x3c   : > { %s2467_s12 = smov 128   ;;  %s2468_s13 = smov 8  }
  0x3d   : > { %1823 = dma.hbm_to_vmem [thread:$0]  (!%p2557_p11), %s3004_s3, 2048, %s2561_s6, [#allocation6], %s2467_s12, %s2467_s12, %s2468_s13  }
  0x3e   : > { %s2616_s16 = sadd.s32 1, %s2461_s21   ;;  %s29_s23 = sadd.s32 1, %s2457_s20 }
  0x3f   : > { %s26_s17 = ssub.s32 %s2461_s21, %s2616_s16  ;;  %p36_p6 = scmp.ne.s32.totalorder %s2457_s20, %s2453_s19 }
  0x40   : > { %p27_p13 = scmp.eq.s32.totalorder %s26_s17, 0  ;;  %p37_p10 = scmp.eq.s32.totalorder %s2461_s21, 0 }
  0x41   : > { %p3014_p5 = scmp.eq.s32.totalorder %s2527_s22, 1  ;;  %p1834_p9 = scmp.lt.s32.totalorder %s2461_s21, 2 }
  0x42   : > { %s2625_s27 = scalar_select %p27_p13, %s2457_s20, %s29_s23  }
  0x43   : > { %p38_p3 = por %p37_p10, %p36_p6  ;;  %p2629_p7 = por %p3014_p5, %p36_p6 }
  0x44   : > { %s208_s29 = sand.u32 1, %s2457_s20   ;;  %s1690_s6 = sshll.u32 %s2461_s21, 13 }
  0x45   : > { %s3015_s30 = scalar_select %p2629_p7, 1, 0 }
  0x46   : > { %s1641_s7 = sshll.u32 %s208_s29, 9  ;;  %s2639_s10 = scalar_lea.hbm %s3001_s0, %s1690_s6 }
  0x47   : > { %s212_s11 = scalar_lea.vmem [#allocation2], %s1641_s7  ;;  %p2643_p11 = pnand %p1834_p9, %p38_p3 }
  0x48   : > { %s220_s28 = sshll.u32 %s212_s11, 4  ;;  %s2647_s13 = scalar_lea.sflag [#allocation3], %s208_s29  ;;  %s2641_s28 = int_to_ptr.vmem [resolvable:$true] %s220_s28 }
  0x49   : > { %s2361_s14 = scalar_lea.hbm %s2639_s10, 8192  ;;  %p2363_p0 = pneg %p2643_p11 }
  0x4a   : > { %p2362_p12 = scmp.ne.s32.totalorder %s2639_s10, %s2361_s14  ;;  %s2366_s23 = scalar_lea.hbm %s3001_s0, 16384 }
  0x4b   : > { %p2367_p13 = scmp.lt.u32.totalorder %s2639_s10, %s3001_s0  ;;  %p2368_p6 = scmp.lt.u32.totalorder %s2366_s23, %s2361_s14 }
  0x4c   : > { %p2364_p2 = pnand %p2363_p0, %p2362_p12  ;;  %p2370_p3 = scmp.lt.u32.totalorder %s2361_s14, %s2639_s10 }
  0x4d   : > { %p2369_p10 = por %p2368_p6, %p2367_p13 }
  0x4e   : > { %p2365_p1 = pneg %p2364_p2 }
  0x4f   : > { %p2371_p5 = por %p2370_p3, %p2369_p10 }
  0x51   : > { %p2372_p9 = pnand %p2371_p5, %p2365_p1 }
  0x53   : > { %2375 = shalt.err (!%p2372_p9)
}
  0x54   : > { %s2376_s29 = scalar_lea.vmem %s2641_s28, 8192  ;;  %s2469_s8 = smov [#allocation2]  }
  0x55   : > { %p2377_p12 = scmp.ne.s32.totalorder %s2641_s28, %s2376_s29  ;;  %s2381_s9 = sshll.u32 %s2469_s8, 4  ;;  %s2382_s9 = int_to_ptr.vmem [resolvable:$false] %s2381_s9 }
  0x56   : > { %s2383_s11 = scalar_lea.vmem %s2382_s9, 16384  ;;  %p2384_p4 = scmp.lt.s32.totalorder %s2641_s28, %s2382_s9 }
  0x57   : > { %p2379_p2 = pnand %p2377_p12, %p2363_p0  ;;  %p2385_p13 = scmp.lt.s32.totalorder %s2383_s11, %s2376_s29 }
  0x59   : > { %p2380_p7 = pneg %p2379_p2  ;;  %p2386_p6 = por %p2385_p13, %p2384_p4 }
  0x5b   : > { %p2387_p10 = pnand %p2386_p6, %p2380_p7 }
  0x5d   : > { %2390 = shalt.err (!%p2387_p10)
}
  0x5e   : > { %s2470_s14 = smov 256   ;;  %s2471_s15 = smov 16  }
  0x5f   : > { %1827 = dma.hbm_to_vmem [thread:$0]  (!%p2643_p11), %s2639_s10, 8192, %s2641_s28, %s2647_s13, %s2470_s14, %s2470_s14, %s2471_s15  }
  0x60   : > { %232 = sbr.rel (%p2546_p8) target bundleno = 775 (0x307), region = 40  ;;  %s2678_s17 = sand.u32 (!%p2546_p8), 1, %s2453_s19  }
  0x61   : > { %s1646_s23 = sshll.u32 (!%p2546_p8), %s2678_s17, 9  ;;  %s235_s7 = scalar_lea.sflag (!%p2546_p8), [#allocation3], %s2678_s17 }
  0x62   : > { %s2684_s6 = scalar_lea.vmem (!%p2546_p8), [#allocation2], %s1646_s23  ;;  %p3017_p4 = scmp.ne.s32.totalorder (!%p2546_p8), %s3010_s24, 0 }
  0x67   : > { %2436 = dma.done.wait (%p3017_p4), %s235_s7, 8192  }
  0x68   : > { %2438 = vsyncadd (%p3017_p4), %s235_s7, 4294959104  ;;  %p3018_p7 = scmp.eq.s32.totalorder %s2527_s22, 0 }
  0x6a   : > { %2440 = dma.done.wait (%p3018_p7), [#allocation6], 4096   ;;  %p3019_p8 = pmov %p3018_p7 }
  0x6b   : > { %v1881_v0 = vld [vmem:[#allocation5 + $0x40] sm:$0xff]   ;;  %v1883_v2 = vld [vmem:[#allocation5 + $0x48] sm:$0xff]   ;;  %v1885_v4 = vld [vmem:[#allocation5 + $0x50] sm:$0xff]   ;;  %s2836_s12 = scalar_lea.vmem [#allocation8], %s1646_s23  ;;  %s1692_s13 = sshll.u32 %s2527_s22, 13 }
  0x6c   : > { %2442 = vsyncadd (%p3019_p8), [#allocation6], 4294963200  ;;  %v1882_v1 = vld [vmem:[#allocation5] sm:$0xff]   ;;  %1693 = vmatprep.subr.bf16.mxu0 %v1881_v0  ;;  %v1884_v3 = vld [vmem:[#allocation5 + $0x8] sm:$0xff]   ;;  %s1544_s29 = sshll.u32 %s2836_s12, 4  ;;  %s2953_s11 = scalar_lea.hbm %s3006_s5, %s1692_s13  ;;  %s2955_s29 = int_to_ptr.vmem [resolvable:$true] %s1544_s29 }
  0x6d   : > { %1694 = vmatpush3.bf16.msra.mxu0 %v1882_v1  ;;  %v1886_v5 = vld [vmem:[#allocation5 + $0x10] sm:$0xff]   ;;  %v1887_v6 = vld [vmem:[#allocation5 + $0x58] sm:$0xff]   ;;  %v1889_v8 = vld [vmem:[#allocation5 + $0x60] sm:$0xff]   ;;  %s1530_s14 = scalar_lea.sflag [#allocation4], %s2678_s17  ;;  %s2391_s15 = scalar_lea.vmem %s2955_s29, 8192 }
  0x6e   : > { %1695 = vmatprep.subr.bf16.mxu0 %v1883_v2  ;;  %v1888_v7 = vld [vmem:[#allocation5 + $0x18] sm:$0xff]   ;;  %v1890_v9 = vld [vmem:[#allocation5 + $0x20] sm:$0xff]   ;;  %v1891_v10 = vld [vmem:[#allocation5 + $0x68] sm:$0xff]   ;;  %p2392_p11 = scmp.ne.s32.totalorder %s2955_s29, %s2391_s15  ;;  %p3020_p0 = scmp.ne.s32.totalorder %s3015_s30, 0 }
  0x6f   : > { %v277_v11 = vld [vmem:[%s2684_s6 + $0x8] sm:$0xff]  ;;  %v279_v12 = vld [vmem:[%s2684_s6 + $0x18] sm:$0xff]  ;;  %v1893_v15 = vld [vmem:[#allocation5 + $0x70] sm:$0xff]   ;;  %s2473_s22 = smov [#allocation8]  }
  0x70   : > { %v341_v13 = vpack.c.bf16 %v279_v12, %v277_v11  ;;  %v1892_v14 = vld [vmem:[#allocation5 + $0x28] sm:$0xff]   ;;  %v1894_v16 = vld [vmem:[#allocation5 + $0x30] sm:$0xff]   ;;  %v1895_v17 = vld [vmem:[#allocation5 + $0x78] sm:$0xff]   ;;  %p2393_p1 = pnand %p2392_p11, %p3020_p0  ;;  %s2395_s23 = sshll.u32 %s2473_s22, 4  ;;  %s2396_s23 = int_to_ptr.vmem [resolvable:$false] %s2395_s23 }
  0x71   : > { %1696 = vmatpush3.bf16.msra.mxu0 %v1884_v3  ;;  %v1896_v18 = vld [vmem:[#allocation5 + $0x38] sm:$0xff]   ;;  %v276_v19 = vld [vmem:[%s2684_s6] sm:$0xff]  ;;  %v278_v20 = vld [vmem:[%s2684_s6 + $0x10] sm:$0xff]  ;;  %s2397_s7 = scalar_lea.vmem %s2396_s23, 16384  ;;  %p2398_p5 = scmp.lt.s32.totalorder %s2955_s29, %s2396_s23 }
  0x72   : > { %1697 = vmatprep.subr.bf16.mxu0 %v1885_v4  ;;  %539 = vmatprep.mubr.bf16.mxu0 %v341_v13  ;;  %v281_v21 = vld [vmem:[%s2684_s6 + $0x28] sm:$0xff]  ;;  %v283_v22 = vld [vmem:[%s2684_s6 + $0x38] sm:$0xff]  ;;  %v340_v23 = vpack.c.bf16 %v278_v20, %v276_v19  ;;  %v280_v25 = vld [vmem:[%s2684_s6 + $0x20] sm:$0xff]  ;;  %p2394_p3 = pneg %p2393_p1  ;;  %p2399_p9 = scmp.lt.s32.totalorder %s2397_s7, %s2391_s15 }
  0x73   : > { %v343_v24 = vpack.c.bf16 %v283_v22, %v281_v21  ;;  %v282_v26 = vld [vmem:[%s2684_s6 + $0x30] sm:$0xff]  ;;  %v285_v27 = vld [vmem:[%s2684_s6 + $0x48] sm:$0xff]  ;;  %v287_v28 = vld [vmem:[%s2684_s6 + $0x58] sm:$0xff] }
  0x74   : > { %v342_v29 = vpack.c.bf16 %v282_v26, %v280_v25  ;;  %v345_v30 = vpack.c.bf16 %v287_v28, %v285_v27  ;;  %v284_v31 = vld [vmem:[%s2684_s6 + $0x40] sm:$0xff]  ;;  %v286_v32 = vld [vmem:[%s2684_s6 + $0x50] sm:$0xff]  ;;  %v289_v33 = vld [vmem:[%s2684_s6 + $0x68] sm:$0xff]  ;;  %p2400_p12 = por %p2399_p9, %p2398_p5 }
  0x75   : > { %1698 = vmatpush3.bf16.msra.mxu0 %v1886_v5  ;;  %v291_v34 = vld [vmem:[%s2684_s6 + $0x78] sm:$0xff]  ;;  %v344_v35 = vpack.c.bf16 %v286_v32, %v284_v31  ;;  %v288_v37 = vld [vmem:[%s2684_s6 + $0x60] sm:$0xff]  ;;  %v290_v38 = vld [vmem:[%s2684_s6 + $0x70] sm:$0xff] }
  0x76   : > { %1699 = vmatprep.subr.bf16.mxu0 %v1887_v6  ;;  %v347_v36 = vpack.c.bf16 %v291_v34, %v289_v33  ;;  %v293_v39 = vld [vmem:[%s2684_s6 + $0x88] sm:$0xff]  ;;  %v295_v40 = vld [vmem:[%s2684_s6 + $0x98] sm:$0xff]  ;;  %v346_v41 = vpack.c.bf16 %v290_v38, %v288_v37  ;;  %v292_v43 = vld [vmem:[%s2684_s6 + $0x80] sm:$0xff]  ;;  %p2401_p2 = pnand %p2400_p12, %p2394_p3 }
  0x77   : > { %v349_v42 = vpack.c.bf16 %v295_v40, %v293_v39  ;;  %v294_v44 = vld [vmem:[%s2684_s6 + $0x90] sm:$0xff]  ;;  %v297_v45 = vld [vmem:[%s2684_s6 + $0xa8] sm:$0xff]  ;;  %v299_v46 = vld [vmem:[%s2684_s6 + $0xb8] sm:$0xff] }
  0x78   : > { %v348_v47 = vpack.c.bf16 %v294_v44, %v292_v43  ;;  %v351_v48 = vpack.c.bf16 %v299_v46, %v297_v45  ;;  %v296_v49 = vld [vmem:[%s2684_s6 + $0xa0] sm:$0xff]  ;;  %v298_v50 = vld [vmem:[%s2684_s6 + $0xb0] sm:$0xff]  ;;  %v301_v51 = vld [vmem:[%s2684_s6 + $0xc8] sm:$0xff] }
  0x79   : > { %1700 = vmatpush3.bf16.msra.mxu0 %v1888_v7  ;;  %v303_v52 = vld [vmem:[%s2684_s6 + $0xd8] sm:$0xff]  ;;  %v350_v53 = vpack.c.bf16 %v298_v50, %v296_v49  ;;  %v300_v55 = vld [vmem:[%s2684_s6 + $0xc0] sm:$0xff]  ;;  %v302_v56 = vld [vmem:[%s2684_s6 + $0xd0] sm:$0xff] }
  0x7a   : > { %1701 = vmatprep.subr.bf16.mxu0 %v1889_v8  ;;  %v353_v54 = vpack.c.bf16 %v303_v52, %v301_v51  ;;  %v305_v57 = vld [vmem:[%s2684_s6 + $0xe8] sm:$0xff]  ;;  %v307_v58 = vld [vmem:[%s2684_s6 + $0xf8] sm:$0xff]  ;;  %v352_v59 = vpack.c.bf16 %v302_v56, %v300_v55  ;;  %v304_v61 = vld [vmem:[%s2684_s6 + $0xe0] sm:$0xff] }
  0x7b   : > { %v355_v60 = vpack.c.bf16 %v307_v58, %v305_v57  ;;  %v306_v62 = vld [vmem:[%s2684_s6 + $0xf0] sm:$0xff]  ;;  %v309_v63 = vld [vmem:[%s2684_s6 + $0x108] sm:$0xff]  ;;  %v311_v0 = vld [vmem:[%s2684_s6 + $0x118] sm:$0xff] }
  0x7c   : > { %v354_v1 = vpack.c.bf16 %v306_v62, %v304_v61  ;;  %v357_v2 = vpack.c.bf16 %v311_v0, %v309_v63  ;;  %v308_v3 = vld [vmem:[%s2684_s6 + $0x100] sm:$0xff]  ;;  %v310_v4 = vld [vmem:[%s2684_s6 + $0x110] sm:$0xff]  ;;  %v313_v5 = vld [vmem:[%s2684_s6 + $0x128] sm:$0xff]  ;;  %v2472_v0 = vmov 0  }
  0x7d   : > { %1702 = vmatpush3.bf16.msra.mxu0 %v1890_v9  ;;  %v315_v6 = vld [vmem:[%s2684_s6 + $0x138] sm:$0xff]  ;;  %v356_v7 = vpack.c.bf16 %v310_v4, %v308_v3  ;;  %v312_v9 = vld [vmem:[%s2684_s6 + $0x120] sm:$0xff]  ;;  %v317_v11 = vld [vmem:[%s2684_s6 + $0x148] sm:$0xff]  ;;  %984 = vmatprep.mubr.bf16.mxu1 %v2472_v0 }
  0x7e   : > { %1703 = vmatprep.subr.bf16.mxu0 %v1891_v10  ;;  %v359_v8 = vpack.c.bf16 %v315_v6, %v313_v5  ;;  %v314_v10 = vld [vmem:[%s2684_s6 + $0x130] sm:$0xff]  ;;  %v319_v12 = vld [vmem:[%s2684_s6 + $0x158] sm:$0xff]  ;;  %v320_v21 = vld [vmem:[%s2684_s6 + $0x160] sm:$0xff] }
  0x7f   : > { %v358_v13 = vpack.c.bf16 %v314_v10, %v312_v9  ;;  %v322_v22 = vld [vmem:[%s2684_s6 + $0x170] sm:$0xff]  ;;  %v1897_v27 = vld [vmem:[#allocation7 + $0x4] ss:$8 sps:$4 sm:$0xff]   ;;  %v1899_v28 = vld [vmem:[#allocation7] ss:$8 sps:$4 sm:$0xff]  }
  0x80   : > { %v362_v25 = vpack.c.bf16 %v322_v22, %v320_v21  ;;  %952 = vmatprep.subr.bf16.mxu1 %v1897_v27  ;;  %v329_v31 = vld [vmem:[%s2684_s6 + $0x1a8] sm:$0xff]  ;;  %v331_v32 = vld [vmem:[%s2684_s6 + $0x1b8] sm:$0xff]  ;;  %v328_v39 = vld [vmem:[%s2684_s6 + $0x1a0] sm:$0xff] }
  0x81   : > { %1704 = vmatpush3.bf16.msra.mxu0 %v1892_v14  ;;  %v361_v14 = vpack.c.bf16 %v319_v12, %v317_v11  ;;  %953 = vmatpush1.bf16.msra.mxu1 %v1899_v28  ;;  %v1900_v33 = vld [vmem:[#allocation7 + $0x14] ss:$8 sps:$4 sm:$0xff]   ;;  %v1903_v37 = vld [vmem:[#allocation7 + $0x24] ss:$8 sps:$4 sm:$0xff]   ;;  %v1905_v38 = vld [vmem:[#allocation7 + $0x20] ss:$8 sps:$4 sm:$0xff]  }
  0x82   : > { %1705 = vmatprep.subr.bf16.mxu0 %v1893_v15  ;;  %v316_v15 = vld [vmem:[%s2684_s6 + $0x140] sm:$0xff]  ;;  %954 = vmatprep.subr.bf16.mxu1 %v1900_v33  ;;  %v330_v40 = vld [vmem:[%s2684_s6 + $0x1b0] sm:$0xff]  ;;  %v337_v51 = vld [vmem:[%s2684_s6 + $0x1e8] sm:$0xff] }
  0x83   : > { %v1906_v43 = vld [vmem:[#allocation7 + $0x34] ss:$8 sps:$4 sm:$0xff]   ;;  %v366_v44 = vpack.c.bf16 %v330_v40, %v328_v39  ;;  %v1908_v45 = vld [vmem:[#allocation7 + $0x30] ss:$8 sps:$4 sm:$0xff]   ;;  %v332_v49 = vld [vmem:[%s2684_s6 + $0x1c0] sm:$0xff] }
  0x84   : > { %v334_v50 = vld [vmem:[%s2684_s6 + $0x1d0] sm:$0xff]  ;;  %v339_v52 = vld [vmem:[%s2684_s6 + $0x1f8] sm:$0xff]  ;;  %v1915_v57 = vld [vmem:[#allocation7 + $0x64] ss:$8 sps:$4 sm:$0xff]  }
  0x85   : > { %1706 = vmatpush3.bf16.msra.mxu0 %v1894_v16  ;;  %v318_v16 = vld [vmem:[%s2684_s6 + $0x150] sm:$0xff]  ;;  %v371_v56 = vpack.c.bf16 %v339_v52, %v337_v51  ;;  %v1917_v58 = vld [vmem:[#allocation7 + $0x60] ss:$8 sps:$4 sm:$0xff]  }
  0x86   : > { %1707 = vmatprep.subr.bf16.mxu0 %v1895_v17  ;;  %v321_v17 = vld [vmem:[%s2684_s6 + $0x168] sm:$0xff]  ;;  %v360_v19 = vpack.c.bf16 %v318_v16, %v316_v15  ;;  %v1914_v55 = vld [vmem:[#allocation7 + $0x50] ss:$8 sps:$4 sm:$0xff]   ;;  %v1918_v61 = vld [vmem:[#allocation7 + $0x74] ss:$8 sps:$4 sm:$0xff]  }
  0x87   : > { %v1920_v63 = vld [vmem:[#allocation7 + $0x70] ss:$8 sps:$4 sm:$0xff]  }
  0x89   : > { %1708 = vmatpush3.bf16.msra.mxu0 %v1896_v18  ;;  %v323_v18 = vld [vmem:[%s2684_s6 + $0x178] sm:$0xff] }
  0x8a   : > { %v363_v20 = vpack.c.bf16 %v323_v18, %v321_v17 }
  0x8c   : > { %540 = vmatmul.mubr.bf16.vlgmr.msra.gmra.mrb[0].mxu0 %v340_v23  ;;  %v325_v23 = vld [vmem:[%s2684_s6 + $0x188] sm:$0xff] }
  0x8d   : > { %547 = vmatprep.mubr.bf16.mxu0 %v343_v24  ;;  %v327_v24 = vld [vmem:[%s2684_s6 + $0x198] sm:$0xff] }
  0x8e   : > { %v365_v26 = vpack.c.bf16 %v327_v24, %v325_v23 }
  0x94   : > { %548 = vmatmul.mubr.bf16.gmra.mrb[4].mxu0 %v342_v29  ;;  %v324_v29 = vld [vmem:[%s2684_s6 + $0x180] sm:$0xff] }
  0x95   : > { %555 = vmatprep.mubr.bf16.mxu0 %v345_v30  ;;  %v326_v30 = vld [vmem:[%s2684_s6 + $0x190] sm:$0xff] }
  0x96   : > { %v364_v34 = vpack.c.bf16 %v326_v30, %v324_v29 }
  0x9c   : > { %556 = vmatmul.mubr.bf16.gmra.mrb[8].mxu0 %v344_v35  ;;  %v1902_v35 = vld [vmem:[#allocation7 + $0x10] ss:$8 sps:$4 sm:$0xff]  }
  0x9d   : > { %563 = vmatprep.mubr.bf16.mxu0 %v347_v36  ;;  %v367_v36 = vpack.c.bf16 %v331_v32, %v329_v31  ;;  %955 = vmatpush1.bf16.msra.mxu1 %v1902_v35 }
  0x9e   : > { %956 = vmatprep.subr.bf16.mxu1 %v1903_v37 }
  0xa1   : > { %957 = vmatpush1.bf16.msra.mxu1 %v1905_v38 }
  0xa2   : > { %958 = vmatprep.subr.bf16.mxu1 %v1906_v43 }
  0xa4   : > { %564 = vmatmul.mubr.bf16.gmra.mrb[12].mxu0 %v346_v41  ;;  %v333_v41 = vld [vmem:[%s2684_s6 + $0x1c8] sm:$0xff] }
  0xa5   : > { %571 = vmatprep.mubr.bf16.mxu0 %v349_v42  ;;  %v335_v42 = vld [vmem:[%s2684_s6 + $0x1d8] sm:$0xff]  ;;  %959 = vmatpush1.bf16.msra.mxu1 %v1908_v45 }
  0xa6   : > { %v369_v46 = vpack.c.bf16 %v335_v42, %v333_v41 }
  0xac   : > { %572 = vmatmul.mubr.bf16.gmra.mrb[16].mxu0 %v348_v47  ;;  %v1909_v47 = vld [vmem:[#allocation7 + $0x44] ss:$8 sps:$4 sm:$0xff]  }
  0xad   : > { %579 = vmatprep.mubr.bf16.mxu0 %v351_v48  ;;  %v1911_v48 = vld [vmem:[#allocation7 + $0x40] ss:$8 sps:$4 sm:$0xff]   ;;  %960 = vmatprep.subr.bf16.mxu1 %v1909_v47 }
  0xae   : > { %961 = vmatpush1.bf16.msra.mxu1 %v1911_v48 }
  0xb4   : > { %580 = vmatmul.mubr.bf16.gmra.mrb[20].mxu0 %v350_v53  ;;  %v1912_v53 = vld [vmem:[#allocation7 + $0x54] ss:$8 sps:$4 sm:$0xff]  }
  0xb5   : > { %587 = vmatprep.mubr.bf16.mxu0 %v353_v54  ;;  %v368_v54 = vpack.c.bf16 %v334_v50, %v332_v49  ;;  %962 = vmatprep.subr.bf16.mxu1 %v1912_v53 }
  0xb6   : > { %963 = vmatpush1.bf16.msra.mxu1 %v1914_v55 }
  0xb7   : > { %964 = vmatprep.subr.bf16.mxu1 %v1915_v57 }
  0xba   : > { %965 = vmatpush1.bf16.msra.mxu1 %v1917_v58 }
  0xbb   : > { %966 = vmatprep.subr.bf16.mxu1 %v1918_v61 }
  0xbc   : > { %588 = vmatmul.mubr.bf16.gmra.mrb[24].mxu0 %v352_v59  ;;  %v336_v59 = vld [vmem:[%s2684_s6 + $0x1e0] sm:$0xff] }
  0xbd   : > { %595 = vmatprep.mubr.bf16.mxu0 %v355_v60  ;;  %v338_v60 = vld [vmem:[%s2684_s6 + $0x1f0] sm:$0xff] }
  0xbe   : > { %v370_v62 = vpack.c.bf16 %v338_v60, %v336_v59  ;;  %967 = vmatpush1.bf16.msra.mxu1 %v1920_v63 }
  0xc4   : > { %596 = vmatmul.mubr.bf16.gmra.mrb[28].mxu0 %v354_v1 }
  0xc5   : > { %603 = vmatprep.mubr.bf16.mxu0 %v357_v2  ;;  %v2762_v2 = vld [vmem:[%s3003_s2] ss:$0 sm:$0xff] }
  0xcc   : > { %604 = vmatmul.mubr.bf16.gmra.mrb[32].mxu0 %v356_v7 }
  0xcd   : > { %611 = vmatprep.mubr.bf16.mxu0 %v359_v8 }
  0xd4   : > { %612 = vmatmul.mubr.bf16.gmra.mrb[36].mxu0 %v358_v13 }
  0xd5   : > { %619 = vmatprep.mubr.bf16.mxu0 %v361_v14 }
  0xdc   : > { %620 = vmatmul.mubr.bf16.gmra.mrb[40].mxu0 %v360_v19 }
  0xdd   : > { %627 = vmatprep.mubr.bf16.mxu0 %v363_v20 }
  0xe4   : > { %628 = vmatmul.mubr.bf16.gmra.mrb[44].mxu0 %v362_v25 }
  0xe5   : > { %635 = vmatprep.mubr.bf16.mxu0 %v365_v26 }
  0xec   : > { %636 = vmatmul.mubr.bf16.gmra.mrb[48].mxu0 %v364_v34 }
  0xed   : > { %643 = vmatprep.mubr.bf16.mxu0 %v367_v36 }
  0xf4   : > { %644 = vmatmul.mubr.bf16.gmra.mrb[52].mxu0 %v366_v44 }
  0xf5   : > { %651 = vmatprep.mubr.bf16.mxu0 %v369_v46 }
  0xfc   : > { %652 = vmatmul.mubr.bf16.gmra.mrb[56].mxu0 %v368_v54 }
  0xfd   : > { %659 = vmatprep.mubr.bf16.mxu0 %v371_v56 }
 0x104   : > { %660 = vmatmul.mubr.bf16.gmra.mrb[60].mxu0 %v370_v62 }
 0x15f   : > { %v1709_v1 = vpop.f32.mrb[0].mxu0 }
 0x160   : > { %v1710_v3 = vpop.f32.mrb[1].mxu0 }
 0x161   : > { %v1711_v4 = vadd.f32 %v1710_v3, %v1709_v1  ;;  %v1712_v5 = vpop.f32.mrb[2].mxu0 }
 0x162   : > { %v1713_v6 = vpop.f32.mrb[3].mxu0 }
 0x163   : > { %v542_v7 = vadd.f32 %v1711_v4, %v2762_v2  ;;  %v1714_v8 = vadd.f32 %v1713_v6, %v1712_v5 }
 0x165   : > { %v668_v9 = vsub.f32 0.0, %v542_v7  ;;  %v545_v10 = vadd.f32 %v1714_v8, %v2762_v2 }
 0x167   : > { %v700_v11 = vmul.f32 1.442695, %v668_v9  ;;  %v669_v12 = vsub.f32 0.0, %v545_v10  ;;  %v1715_v13 = vpop.f32.mrb[4].mxu0 }
 0x168   : > { %v1716_v14 = vpop.f32.mrb[5].mxu0 }
 0x169   : > { %1921 = vpow2.f32 %v700_v11  ;;  %v702_v15 = vmul.f32 1.442695, %v669_v12  ;;  %v1717_v16 = vadd.f32 %v1716_v14, %v1715_v13  ;;  %v1718_v17 = vpop.f32.mrb[6].mxu0 }
 0x16a   : > { %v1719_v18 = vpop.f32.mrb[7].mxu0 }
 0x16b   : > { %1923 = vpow2.f32 %v702_v15  ;;  %v550_v19 = vadd.f32 %v1717_v16, %v2762_v2  ;;  %v1720_v20 = vadd.f32 %v1719_v18, %v1718_v17 }
 0x16d   : > { %v670_v21 = vsub.f32 0.0, %v550_v19  ;;  %v553_v22 = vadd.f32 %v1720_v20, %v2762_v2 }
 0x16f   : > { %v704_v23 = vmul.f32 1.442695, %v670_v21  ;;  %v671_v24 = vsub.f32 0.0, %v553_v22  ;;  %v1721_v25 = vpop.f32.mrb[8].mxu0 }
 0x170   : > { %v1722_v26 = vpop.f32.mrb[9].mxu0 }
 0x171   : > { %1925 = vpow2.f32 %v704_v23  ;;  %v706_v27 = vmul.f32 1.442695, %v671_v24  ;;  %v1723_v28 = vadd.f32 %v1722_v26, %v1721_v25  ;;  %v1724_v29 = vpop.f32.mrb[10].mxu0 }
 0x172   : > { %v1725_v30 = vpop.f32.mrb[11].mxu0 }
 0x173   : > { %v1922_v31 = vpop.eup %1921  ;;  %1927 = vpow2.f32 %v706_v27  ;;  %v558_v32 = vadd.f32 %v1723_v28, %v2762_v2  ;;  %v1726_v33 = vadd.f32 %v1725_v30, %v1724_v29 }
 0x174   : > { %v764_v34 = vadd.f32 1.0, %v1922_v31 }
 0x175   : > { %v1924_v35 = vpop.eup %1923  ;;  %v672_v36 = vsub.f32 0.0, %v558_v32  ;;  %v561_v37 = vadd.f32 %v1726_v33, %v2762_v2 }
 0x176   : > { %v765_v38 = vadd.f32 1.0, %v1924_v35  ;;  %1929 = vrcp.f32 %v764_v34 }
 0x177   : > { %v708_v39 = vmul.f32 1.442695, %v672_v36  ;;  %v673_v40 = vsub.f32 0.0, %v561_v37  ;;  %v1727_v41 = vpop.f32.mrb[12].mxu0 }
 0x178   : > { %1931 = vrcp.f32 %v765_v38  ;;  %v1728_v42 = vpop.f32.mrb[13].mxu0 }
 0x179   : > { %1933 = vpow2.f32 %v708_v39  ;;  %v710_v43 = vmul.f32 1.442695, %v673_v40  ;;  %v1729_v44 = vadd.f32 %v1728_v42, %v1727_v41  ;;  %v1730_v45 = vpop.f32.mrb[14].mxu0 }
 0x17a   : > { %v1731_v46 = vpop.f32.mrb[15].mxu0 }
 0x17b   : > { %v1926_v47 = vpop.eup %1925  ;;  %1935 = vpow2.f32 %v710_v43  ;;  %v566_v48 = vadd.f32 %v1729_v44, %v2762_v2  ;;  %v1732_v49 = vadd.f32 %v1731_v46, %v1730_v45 }
 0x17c   : > { %v766_v50 = vadd.f32 1.0, %v1926_v47 }
 0x17d   : > { %v1928_v51 = vpop.eup %1927  ;;  %v674_v52 = vsub.f32 0.0, %v566_v48  ;;  %v569_v53 = vadd.f32 %v1732_v49, %v2762_v2 }
 0x17e   : > { %v767_v54 = vadd.f32 1.0, %v1928_v51  ;;  %1937 = vrcp.f32 %v766_v50 }
 0x17f   : > { %v712_v55 = vmul.f32 1.442695, %v674_v52  ;;  %v675_v56 = vsub.f32 0.0, %v569_v53  ;;  %v1733_v57 = vpop.f32.mrb[16].mxu0 }
 0x180   : > { %1939 = vrcp.f32 %v767_v54  ;;  %v1734_v58 = vpop.f32.mrb[17].mxu0  ;;  %v1930_v59 = vpop.eup %1929 }
 0x181   : > { %1941 = vpow2.f32 %v712_v55  ;;  %v714_v60 = vmul.f32 1.442695, %v675_v56  ;;  %v1735_v61 = vadd.f32 %v1734_v58, %v1733_v57  ;;  %v1736_v62 = vpop.f32.mrb[18].mxu0 }
 0x182   : > { %v1932_v63 = vpop.eup %1931  ;;  %v1737_v1 = vpop.f32.mrb[19].mxu0 }
 0x183   : > { %v1934_v3 = vpop.eup %1933  ;;  %1943 = vpow2.f32 %v714_v60  ;;  %v574_v4 = vadd.f32 %v1735_v61, %v2762_v2  ;;  %v1738_v5 = vadd.f32 %v1737_v1, %v1736_v62  ;;  %v828_v6 = vpack.c.bf16 %v1932_v63, %v1930_v59 }
 0x184   : > { %v768_v7 = vadd.f32 1.0, %v1934_v3 }
 0x185   : > { %v1936_v8 = vpop.eup %1935  ;;  %v676_v9 = vsub.f32 0.0, %v574_v4  ;;  %v577_v10 = vadd.f32 %v1738_v5, %v2762_v2  ;;  %985 = vmatmul.mubr.bf16.vlgmr.msra.gmra.mrb[0].mxu1 %v828_v6 }
 0x186   : > { %v769_v11 = vadd.f32 1.0, %v1936_v8  ;;  %994 = vmatprep.mubr.bf16.mxu1 %v2472_v0  ;;  %1945 = vrcp.f32 %v768_v7 }
 0x187   : > { %v716_v12 = vmul.f32 1.442695, %v676_v9  ;;  %v677_v13 = vsub.f32 0.0, %v577_v10  ;;  %v1739_v14 = vpop.f32.mrb[20].mxu0 }
 0x188   : > { %1947 = vrcp.f32 %v769_v11  ;;  %v1740_v15 = vpop.f32.mrb[21].mxu0  ;;  %v1938_v16 = vpop.eup %1937 }
 0x189   : > { %1949 = vpow2.f32 %v716_v12  ;;  %v718_v17 = vmul.f32 1.442695, %v677_v13  ;;  %v1741_v18 = vadd.f32 %v1740_v15, %v1739_v14  ;;  %v1742_v19 = vpop.f32.mrb[22].mxu0 }
 0x18a   : > { %v1940_v20 = vpop.eup %1939  ;;  %v1743_v21 = vpop.f32.mrb[23].mxu0 }
 0x18b   : > { %v1942_v22 = vpop.eup %1941  ;;  %1951 = vpow2.f32 %v718_v17  ;;  %v582_v23 = vadd.f32 %v1741_v18, %v2762_v2  ;;  %v1744_v24 = vadd.f32 %v1743_v21, %v1742_v19  ;;  %v829_v25 = vpack.c.bf16 %v1940_v20, %v1938_v16 }
 0x18c   : > { %v770_v26 = vadd.f32 1.0, %v1942_v22 }
 0x18d   : > { %v1944_v27 = vpop.eup %1943  ;;  %v678_v28 = vsub.f32 0.0, %v582_v23  ;;  %v585_v29 = vadd.f32 %v1744_v24, %v2762_v2  ;;  %995 = vmatmul.mubr.bf16.gmra.mrb[4].mxu1 %v829_v25 }
 0x18e   : > { %v771_v30 = vadd.f32 1.0, %v1944_v27  ;;  %1004 = vmatprep.mubr.bf16.mxu1 %v2472_v0  ;;  %1953 = vrcp.f32 %v770_v26 }
 0x18f   : > { %v720_v31 = vmul.f32 1.442695, %v678_v28  ;;  %v679_v32 = vsub.f32 0.0, %v585_v29  ;;  %v1745_v33 = vpop.f32.mrb[24].mxu0 }
 0x190   : > { %1955 = vrcp.f32 %v771_v30  ;;  %v1746_v34 = vpop.f32.mrb[25].mxu0  ;;  %v1946_v35 = vpop.eup %1945 }
 0x191   : > { %1957 = vpow2.f32 %v720_v31  ;;  %v722_v36 = vmul.f32 1.442695, %v679_v32  ;;  %v1747_v37 = vadd.f32 %v1746_v34, %v1745_v33  ;;  %v1748_v38 = vpop.f32.mrb[26].mxu0 }
 0x192   : > { %v1948_v39 = vpop.eup %1947  ;;  %v1749_v40 = vpop.f32.mrb[27].mxu0 }
 0x193   : > { %v1950_v41 = vpop.eup %1949  ;;  %1959 = vpow2.f32 %v722_v36  ;;  %v590_v42 = vadd.f32 %v1747_v37, %v2762_v2  ;;  %v1750_v43 = vadd.f32 %v1749_v40, %v1748_v38  ;;  %v830_v44 = vpack.c.bf16 %v1948_v39, %v1946_v35 }
 0x194   : > { %v772_v45 = vadd.f32 1.0, %v1950_v41 }
 0x195   : > { %v1952_v46 = vpop.eup %1951  ;;  %v680_v47 = vsub.f32 0.0, %v590_v42  ;;  %v593_v48 = vadd.f32 %v1750_v43, %v2762_v2  ;;  %1005 = vmatmul.mubr.bf16.gmra.mrb[8].mxu1 %v830_v44 }
 0x196   : > { %v773_v49 = vadd.f32 1.0, %v1952_v46  ;;  %1014 = vmatprep.mubr.bf16.mxu1 %v2472_v0  ;;  %1961 = vrcp.f32 %v772_v45 }
 0x197   : > { %v724_v50 = vmul.f32 1.442695, %v680_v47  ;;  %v681_v51 = vsub.f32 0.0, %v593_v48  ;;  %v1751_v52 = vpop.f32.mrb[28].mxu0 }
 0x198   : > { %1963 = vrcp.f32 %v773_v49  ;;  %v1752_v53 = vpop.f32.mrb[29].mxu0  ;;  %v1954_v54 = vpop.eup %1953 }
 0x199   : > { %1965 = vpow2.f32 %v724_v50  ;;  %v726_v55 = vmul.f32 1.442695, %v681_v51  ;;  %v1753_v56 = vadd.f32 %v1752_v53, %v1751_v52  ;;  %v1754_v57 = vpop.f32.mrb[30].mxu0 }
 0x19a   : > { %v1956_v58 = vpop.eup %1955  ;;  %v1755_v59 = vpop.f32.mrb[31].mxu0 }
 0x19b   : > { %v1958_v60 = vpop.eup %1957  ;;  %1967 = vpow2.f32 %v726_v55  ;;  %v598_v61 = vadd.f32 %v1753_v56, %v2762_v2  ;;  %v1756_v62 = vadd.f32 %v1755_v59, %v1754_v57  ;;  %v831_v63 = vpack.c.bf16 %v1956_v58, %v1954_v54 }
 0x19c   : > { %v774_v1 = vadd.f32 1.0, %v1958_v60 }
 0x19d   : > { %v1960_v3 = vpop.eup %1959  ;;  %v682_v4 = vsub.f32 0.0, %v598_v61  ;;  %v601_v5 = vadd.f32 %v1756_v62, %v2762_v2  ;;  %1015 = vmatmul.mubr.bf16.gmra.mrb[12].mxu1 %v831_v63 }
 0x19e   : > { %v775_v6 = vadd.f32 1.0, %v1960_v3  ;;  %1024 = vmatprep.mubr.bf16.mxu1 %v2472_v0  ;;  %1969 = vrcp.f32 %v774_v1 }
 0x19f   : > { %v728_v7 = vmul.f32 1.442695, %v682_v4  ;;  %v683_v8 = vsub.f32 0.0, %v601_v5  ;;  %v1757_v9 = vpop.f32.mrb[32].mxu0 }
 0x1a0   : > { %1971 = vrcp.f32 %v775_v6  ;;  %v1758_v10 = vpop.f32.mrb[33].mxu0  ;;  %v1962_v11 = vpop.eup %1961 }
 0x1a1   : > { %1973 = vpow2.f32 %v728_v7  ;;  %v730_v12 = vmul.f32 1.442695, %v683_v8  ;;  %v1759_v13 = vadd.f32 %v1758_v10, %v1757_v9  ;;  %v1760_v14 = vpop.f32.mrb[34].mxu0 }
 0x1a2   : > { %v1964_v15 = vpop.eup %1963  ;;  %v1761_v16 = vpop.f32.mrb[35].mxu0 }
 0x1a3   : > { %v1966_v17 = vpop.eup %1965  ;;  %1975 = vpow2.f32 %v730_v12  ;;  %v606_v18 = vadd.f32 %v1759_v13, %v2762_v2  ;;  %v1762_v19 = vadd.f32 %v1761_v16, %v1760_v14  ;;  %v832_v20 = vpack.c.bf16 %v1964_v15, %v1962_v11 }
 0x1a4   : > { %v776_v21 = vadd.f32 1.0, %v1966_v17 }
 0x1a5   : > { %v1968_v22 = vpop.eup %1967  ;;  %v684_v23 = vsub.f32 0.0, %v606_v18  ;;  %v609_v24 = vadd.f32 %v1762_v19, %v2762_v2  ;;  %1025 = vmatmul.mubr.bf16.gmra.mrb[16].mxu1 %v832_v20 }
 0x1a6   : > { %v777_v25 = vadd.f32 1.0, %v1968_v22  ;;  %1034 = vmatprep.mubr.bf16.mxu1 %v2472_v0  ;;  %1977 = vrcp.f32 %v776_v21 }
 0x1a7   : > { %v732_v26 = vmul.f32 1.442695, %v684_v23  ;;  %v685_v27 = vsub.f32 0.0, %v609_v24  ;;  %v1763_v28 = vpop.f32.mrb[36].mxu0 }
 0x1a8   : > { %1979 = vrcp.f32 %v777_v25  ;;  %v1764_v29 = vpop.f32.mrb[37].mxu0  ;;  %v1970_v30 = vpop.eup %1969 }
 0x1a9   : > { %1981 = vpow2.f32 %v732_v26  ;;  %v734_v31 = vmul.f32 1.442695, %v685_v27  ;;  %v1765_v32 = vadd.f32 %v1764_v29, %v1763_v28  ;;  %v1766_v33 = vpop.f32.mrb[38].mxu0 }
 0x1aa   : > { %v1972_v34 = vpop.eup %1971  ;;  %v1767_v35 = vpop.f32.mrb[39].mxu0 }
 0x1ab   : > { %v1974_v36 = vpop.eup %1973  ;;  %1983 = vpow2.f32 %v734_v31  ;;  %v614_v37 = vadd.f32 %v1765_v32, %v2762_v2  ;;  %v1768_v38 = vadd.f32 %v1767_v35, %v1766_v33  ;;  %v833_v39 = vpack.c.bf16 %v1972_v34, %v1970_v30 }
 0x1ac   : > { %v778_v40 = vadd.f32 1.0, %v1974_v36 }
 0x1ad   : > { %v1976_v41 = vpop.eup %1975  ;;  %v686_v42 = vsub.f32 0.0, %v614_v37  ;;  %v617_v43 = vadd.f32 %v1768_v38, %v2762_v2  ;;  %1035 = vmatmul.mubr.bf16.gmra.mrb[20].mxu1 %v833_v39 }
 0x1ae   : > { %v779_v44 = vadd.f32 1.0, %v1976_v41  ;;  %1044 = vmatprep.mubr.bf16.mxu1 %v2472_v0  ;;  %1985 = vrcp.f32 %v778_v40 }
 0x1af   : > { %v736_v45 = vmul.f32 1.442695, %v686_v42  ;;  %v687_v46 = vsub.f32 0.0, %v617_v43  ;;  %v1769_v47 = vpop.f32.mrb[40].mxu0 }
 0x1b0   : > { %1987 = vrcp.f32 %v779_v44  ;;  %v1770_v48 = vpop.f32.mrb[41].mxu0  ;;  %v1978_v49 = vpop.eup %1977 }
 0x1b1   : > { %1989 = vpow2.f32 %v736_v45  ;;  %v738_v50 = vmul.f32 1.442695, %v687_v46  ;;  %v1771_v51 = vadd.f32 %v1770_v48, %v1769_v47  ;;  %v1772_v52 = vpop.f32.mrb[42].mxu0 }
 0x1b2   : > { %v1980_v53 = vpop.eup %1979  ;;  %v1773_v54 = vpop.f32.mrb[43].mxu0 }
 0x1b3   : > { %v1982_v55 = vpop.eup %1981  ;;  %1991 = vpow2.f32 %v738_v50  ;;  %v622_v56 = vadd.f32 %v1771_v51, %v2762_v2  ;;  %v1774_v57 = vadd.f32 %v1773_v54, %v1772_v52  ;;  %v834_v58 = vpack.c.bf16 %v1980_v53, %v1978_v49 }
 0x1b4   : > { %v780_v59 = vadd.f32 1.0, %v1982_v55 }
 0x1b5   : > { %v1984_v60 = vpop.eup %1983  ;;  %v688_v61 = vsub.f32 0.0, %v622_v56  ;;  %v625_v62 = vadd.f32 %v1774_v57, %v2762_v2  ;;  %1045 = vmatmul.mubr.bf16.gmra.mrb[24].mxu1 %v834_v58 }
 0x1b6   : > { %v781_v63 = vadd.f32 1.0, %v1984_v60  ;;  %1054 = vmatprep.mubr.bf16.mxu1 %v2472_v0  ;;  %1993 = vrcp.f32 %v780_v59 }
 0x1b7   : > { %v740_v1 = vmul.f32 1.442695, %v688_v61  ;;  %v689_v3 = vsub.f32 0.0, %v625_v62  ;;  %v1775_v4 = vpop.f32.mrb[44].mxu0 }
 0x1b8   : > { %1995 = vrcp.f32 %v781_v63  ;;  %v1776_v5 = vpop.f32.mrb[45].mxu0  ;;  %v1986_v6 = vpop.eup %1985 }
 0x1b9   : > { %1997 = vpow2.f32 %v740_v1  ;;  %v742_v7 = vmul.f32 1.442695, %v689_v3  ;;  %v1777_v8 = vadd.f32 %v1776_v5, %v1775_v4  ;;  %v1778_v9 = vpop.f32.mrb[46].mxu0 }
 0x1ba   : > { %v1988_v10 = vpop.eup %1987  ;;  %v1779_v11 = vpop.f32.mrb[47].mxu0 }
 0x1bb   : > { %v1990_v12 = vpop.eup %1989  ;;  %1999 = vpow2.f32 %v742_v7  ;;  %v630_v13 = vadd.f32 %v1777_v8, %v2762_v2  ;;  %v1780_v14 = vadd.f32 %v1779_v11, %v1778_v9  ;;  %v835_v15 = vpack.c.bf16 %v1988_v10, %v1986_v6 }
 0x1bc   : > { %v782_v16 = vadd.f32 1.0, %v1990_v12 }
 0x1bd   : > { %v1992_v17 = vpop.eup %1991  ;;  %v690_v18 = vsub.f32 0.0, %v630_v13  ;;  %v633_v19 = vadd.f32 %v1780_v14, %v2762_v2  ;;  %1055 = vmatmul.mubr.bf16.gmra.mrb[28].mxu1 %v835_v15 }
 0x1be   : > { %v783_v20 = vadd.f32 1.0, %v1992_v17  ;;  %1064 = vmatprep.mubr.bf16.mxu1 %v2472_v0  ;;  %2001 = vrcp.f32 %v782_v16 }
 0x1bf   : > { %v744_v21 = vmul.f32 1.442695, %v690_v18  ;;  %v691_v22 = vsub.f32 0.0, %v633_v19  ;;  %v1781_v23 = vpop.f32.mrb[48].mxu0 }
 0x1c0   : > { %2003 = vrcp.f32 %v783_v20  ;;  %v1782_v24 = vpop.f32.mrb[49].mxu0  ;;  %v1994_v25 = vpop.eup %1993 }
 0x1c1   : > { %2005 = vpow2.f32 %v744_v21  ;;  %v746_v26 = vmul.f32 1.442695, %v691_v22  ;;  %v1783_v27 = vadd.f32 %v1782_v24, %v1781_v23  ;;  %v1784_v28 = vpop.f32.mrb[50].mxu0 }
 0x1c2   : > { %v1996_v29 = vpop.eup %1995  ;;  %v1785_v30 = vpop.f32.mrb[51].mxu0 }
 0x1c3   : > { %v1998_v31 = vpop.eup %1997  ;;  %2007 = vpow2.f32 %v746_v26  ;;  %v638_v32 = vadd.f32 %v1783_v27, %v2762_v2  ;;  %v1786_v33 = vadd.f32 %v1785_v30, %v1784_v28  ;;  %v836_v34 = vpack.c.bf16 %v1996_v29, %v1994_v25 }
 0x1c4   : > { %v784_v35 = vadd.f32 1.0, %v1998_v31 }
 0x1c5   : > { %v2000_v36 = vpop.eup %1999  ;;  %v692_v37 = vsub.f32 0.0, %v638_v32  ;;  %v641_v38 = vadd.f32 %v1786_v33, %v2762_v2  ;;  %1065 = vmatmul.mubr.bf16.gmra.mrb[32].mxu1 %v836_v34 }
 0x1c6   : > { %v785_v39 = vadd.f32 1.0, %v2000_v36  ;;  %1074 = vmatprep.mubr.bf16.mxu1 %v2472_v0  ;;  %2009 = vrcp.f32 %v784_v35 }
 0x1c7   : > { %v748_v40 = vmul.f32 1.442695, %v692_v37  ;;  %v693_v41 = vsub.f32 0.0, %v641_v38  ;;  %v1787_v42 = vpop.f32.mrb[52].mxu0 }
 0x1c8   : > { %2011 = vrcp.f32 %v785_v39  ;;  %v1788_v43 = vpop.f32.mrb[53].mxu0  ;;  %v2002_v44 = vpop.eup %2001 }
 0x1c9   : > { %2013 = vpow2.f32 %v748_v40  ;;  %v750_v45 = vmul.f32 1.442695, %v693_v41  ;;  %v1789_v46 = vadd.f32 %v1788_v43, %v1787_v42  ;;  %v1790_v47 = vpop.f32.mrb[54].mxu0 }
 0x1ca   : > { %v2004_v48 = vpop.eup %2003  ;;  %v1791_v49 = vpop.f32.mrb[55].mxu0 }
 0x1cb   : > { %v2006_v50 = vpop.eup %2005  ;;  %2015 = vpow2.f32 %v750_v45  ;;  %v646_v51 = vadd.f32 %v1789_v46, %v2762_v2  ;;  %v1792_v52 = vadd.f32 %v1791_v49, %v1790_v47  ;;  %v837_v53 = vpack.c.bf16 %v2004_v48, %v2002_v44 }
 0x1cc   : > { %v786_v54 = vadd.f32 1.0, %v2006_v50 }
 0x1cd   : > { %v2008_v55 = vpop.eup %2007  ;;  %v694_v56 = vsub.f32 0.0, %v646_v51  ;;  %v649_v57 = vadd.f32 %v1792_v52, %v2762_v2  ;;  %1075 = vmatmul.mubr.bf16.gmra.mrb[36].mxu1 %v837_v53 }
 0x1ce   : > { %v787_v58 = vadd.f32 1.0, %v2008_v55  ;;  %1084 = vmatprep.mubr.bf16.mxu1 %v2472_v0  ;;  %2017 = vrcp.f32 %v786_v54 }
 0x1cf   : > { %v752_v59 = vmul.f32 1.442695, %v694_v56  ;;  %v695_v60 = vsub.f32 0.0, %v649_v57  ;;  %v1793_v61 = vpop.f32.mrb[56].mxu0  ;;  %v862_v57 = vlaneseq }
 0x1d0   : > { %2019 = vrcp.f32 %v787_v58  ;;  %v1794_v62 = vpop.f32.mrb[57].mxu0  ;;  %v2010_v63 = vpop.eup %2009 }
 0x1d1   : > { %2021 = vpow2.f32 %v752_v59  ;;  %v754_v1 = vmul.f32 1.442695, %v695_v60  ;;  %v1795_v3 = vadd.f32 %v1794_v62, %v1793_v61  ;;  %v1796_v4 = vpop.f32.mrb[58].mxu0  ;;  %v863_v58 = vshrl.u32 %v862_v57, 7  ;;  %v860_v60 = vld [vmem:[%s3005_s4] sm:$0x3] }
 0x1d2   : > { %v2012_v5 = vpop.eup %2011  ;;  %v1797_v6 = vpop.f32.mrb[59].mxu0 }
 0x1d3   : > { %v2014_v7 = vpop.eup %2013  ;;  %2023 = vpow2.f32 %v754_v1  ;;  %v654_v8 = vadd.f32 %v1795_v3, %v2762_v2  ;;  %v1798_v9 = vadd.f32 %v1797_v6, %v1796_v4  ;;  %v838_v10 = vpack.c.bf16 %v2012_v5, %v2010_v63 }
 0x1d4   : > { %v788_v11 = vadd.f32 1.0, %v2014_v7  ;;  %v864_v59 = vsub.s32 0, %v863_v58  ;;  %v868_v61 = vsub.s32 1, %v863_v58 }
 0x1d5   : > { %v2016_v12 = vpop.eup %2015  ;;  %v696_v13 = vsub.f32 0.0, %v654_v8  ;;  %v657_v14 = vadd.f32 %v1798_v9, %v2762_v2  ;;  %1085 = vmatmul.mubr.bf16.gmra.mrb[40].mxu1 %v838_v10 }
 0x1d6   : > { %v789_v15 = vadd.f32 1.0, %v2016_v12  ;;  %1094 = vmatprep.mubr.bf16.mxu1 %v2472_v0  ;;  %2025 = vrcp.f32 %v788_v11  ;;  %v2814_v62 = vrot.slane %v860_v60, %v864_v59  ;;  %v2816_v63 = vrot.slane %v860_v60, %v868_v61 }
 0x1d7   : > { %v756_v16 = vmul.f32 1.442695, %v696_v13  ;;  %v697_v17 = vsub.f32 0.0, %v657_v14  ;;  %v1799_v18 = vpop.f32.mrb[60].mxu0 }
 0x1d8   : > { %2027 = vrcp.f32 %v789_v15  ;;  %v1800_v19 = vpop.f32.mrb[61].mxu0  ;;  %v2018_v20 = vpop.eup %2017 }
 0x1d9   : > { %2029 = vpow2.f32 %v756_v16  ;;  %v758_v21 = vmul.f32 1.442695, %v697_v17  ;;  %v1801_v22 = vadd.f32 %v1800_v19, %v1799_v18  ;;  %v1802_v23 = vpop.f32.mrb[62].mxu0 }
 0x1da   : > { %v2020_v24 = vpop.eup %2019  ;;  %v1803_v25 = vpop.f32.mrb[63].mxu0 }
 0x1db   : > { %v2022_v26 = vpop.eup %2021  ;;  %2031 = vpow2.f32 %v758_v21  ;;  %v662_v27 = vadd.f32 %v1801_v22, %v2762_v2  ;;  %v1804_v28 = vadd.f32 %v1803_v25, %v1802_v23  ;;  %v839_v29 = vpack.c.bf16 %v2020_v24, %v2018_v20 }
 0x1dc   : > { %v790_v30 = vadd.f32 1.0, %v2022_v26 }
 0x1dd   : > { %v2024_v31 = vpop.eup %2023  ;;  %v698_v32 = vsub.f32 0.0, %v662_v27  ;;  %v665_v33 = vadd.f32 %v1804_v28, %v2762_v2  ;;  %1095 = vmatmul.mubr.bf16.gmra.mrb[44].mxu1 %v839_v29 }
 0x1de   : > { %v791_v34 = vadd.f32 1.0, %v2024_v31  ;;  %1104 = vmatprep.mubr.bf16.mxu1 %v2472_v0  ;;  %2033 = vrcp.f32 %v790_v30 }
 0x1df   : > { %v760_v35 = vmul.f32 1.442695, %v698_v32  ;;  %v699_v36 = vsub.f32 0.0, %v665_v33 }
 0x1e0   : > { %2035 = vrcp.f32 %v791_v34  ;;  %v2026_v37 = vpop.eup %2025 }
 0x1e1   : > { %2037 = vpow2.f32 %v760_v35  ;;  %v762_v38 = vmul.f32 1.442695, %v699_v36 }
 0x1e2   : > { %v2028_v39 = vpop.eup %2027 }
 0x1e3   : > { %v2030_v40 = vpop.eup %2029  ;;  %2039 = vpow2.f32 %v762_v38  ;;  %v840_v41 = vpack.c.bf16 %v2028_v39, %v2026_v37 }
 0x1e4   : > { %v792_v42 = vadd.f32 1.0, %v2030_v40 }
 0x1e5   : > { %v2032_v43 = vpop.eup %2031  ;;  %1105 = vmatmul.mubr.bf16.gmra.mrb[48].mxu1 %v840_v41 }
 0x1e6   : > { %v793_v44 = vadd.f32 1.0, %v2032_v43  ;;  %1114 = vmatprep.mubr.bf16.mxu1 %v2472_v0  ;;  %2041 = vrcp.f32 %v792_v42 }
 0x1e8   : > { %2043 = vrcp.f32 %v793_v44  ;;  %v2034_v2 = vpop.eup %2033 }
 0x1ea   : > { %v2036_v45 = vpop.eup %2035 }
 0x1eb   : > { %v2038_v46 = vpop.eup %2037  ;;  %v841_v47 = vpack.c.bf16 %v2036_v45, %v2034_v2 }
 0x1ec   : > { %v794_v48 = vadd.f32 1.0, %v2038_v46 }
 0x1ed   : > { %v2040_v49 = vpop.eup %2039  ;;  %1115 = vmatmul.mubr.bf16.gmra.mrb[52].mxu1 %v841_v47 }
 0x1ee   : > { %v795_v50 = vadd.f32 1.0, %v2040_v49  ;;  %1124 = vmatprep.mubr.bf16.mxu1 %v2472_v0  ;;  %2045 = vrcp.f32 %v794_v48 }
 0x1f0   : > { %2047 = vrcp.f32 %v795_v50  ;;  %v2042_v51 = vpop.eup %2041 }
 0x1f2   : > { %v2044_v52 = vpop.eup %2043 }
 0x1f3   : > { %v842_v53 = vpack.c.bf16 %v2044_v52, %v2042_v51 }
 0x1f5   : > { %1125 = vmatmul.mubr.bf16.gmra.mrb[56].mxu1 %v842_v53 }
 0x1f6   : > { %1134 = vmatprep.mubr.bf16.mxu1 %v2472_v0 }
 0x1f8   : > { %v2046_v54 = vpop.eup %2045 }
 0x1fa   : > { %v2048_v55 = vpop.eup %2047 }
 0x1fb   : > { %v843_v56 = vpack.c.bf16 %v2048_v55, %v2046_v54 }
 0x1fd   : > { %1135 = vmatmul.mubr.bf16.gmra.mrb[60].mxu1 %v843_v56 }
 0x258   : > { %v986_v1 = vpop.f32.mrb[0].mxu1 }
 0x259   : > { %v987_v3 = vadd.f32 %v986_v1, %v2814_v62  ;;  %v988_v0 = vpop.f32.mrb[1].mxu1 }
 0x25a   : > { %v989_v4 = vadd.f32 %v988_v0, %v2816_v63  ;;  %v990_v5 = vpop.f32.mrb[2].mxu1 }
 0x25b   : > { %v1145_v6 = vsub.f32 0.0, %v987_v3  ;;  %v991_v7 = vadd.f32 %v990_v5, %v2814_v62  ;;  %v992_v8 = vpop.f32.mrb[3].mxu1 }
 0x25c   : > { %v1146_v9 = vsub.f32 0.0, %v989_v4  ;;  %v993_v10 = vadd.f32 %v992_v8, %v2816_v63 }
 0x25d   : > { %v1209_v11 = vmul.f32 1.442695, %v1145_v6  ;;  %v1147_v12 = vsub.f32 0.0, %v991_v7 }
 0x25e   : > { %v1211_v13 = vmul.f32 1.442695, %v1146_v9  ;;  %v1148_v14 = vsub.f32 0.0, %v993_v10 }
 0x25f   : > { %2049 = vpow2.f32 %v1209_v11  ;;  %v1213_v15 = vmul.f32 1.442695, %v1147_v12 }
 0x260   : > { %2051 = vpow2.f32 %v1211_v13  ;;  %v1215_v16 = vmul.f32 1.442695, %v1148_v14  ;;  %v996_v17 = vpop.f32.mrb[4].mxu1 }
 0x261   : > { %2053 = vpow2.f32 %v1213_v15  ;;  %v997_v18 = vadd.f32 %v996_v17, %v2814_v62  ;;  %v998_v19 = vpop.f32.mrb[5].mxu1 }
 0x262   : > { %2055 = vpow2.f32 %v1215_v16  ;;  %v999_v20 = vadd.f32 %v998_v19, %v2816_v63  ;;  %v1000_v21 = vpop.f32.mrb[6].mxu1 }
 0x263   : > { %v1149_v22 = vsub.f32 0.0, %v997_v18  ;;  %v1001_v23 = vadd.f32 %v1000_v21, %v2814_v62  ;;  %v1002_v24 = vpop.f32.mrb[7].mxu1 }
 0x264   : > { %v1150_v25 = vsub.f32 0.0, %v999_v20  ;;  %v1003_v26 = vadd.f32 %v1002_v24, %v2816_v63 }
 0x265   : > { %v1217_v27 = vmul.f32 1.442695, %v1149_v22  ;;  %v1151_v28 = vsub.f32 0.0, %v1001_v23 }
 0x266   : > { %v1219_v29 = vmul.f32 1.442695, %v1150_v25  ;;  %v1152_v30 = vsub.f32 0.0, %v1003_v26 }
 0x267   : > { %2057 = vpow2.f32 %v1217_v27  ;;  %v1221_v31 = vmul.f32 1.442695, %v1151_v28 }
 0x268   : > { %2059 = vpow2.f32 %v1219_v29  ;;  %v1223_v32 = vmul.f32 1.442695, %v1152_v30  ;;  %v1006_v33 = vpop.f32.mrb[8].mxu1 }
 0x269   : > { %v2050_v34 = vpop.eup %2049  ;;  %2061 = vpow2.f32 %v1221_v31  ;;  %v1007_v35 = vadd.f32 %v1006_v33, %v2814_v62  ;;  %v1008_v36 = vpop.f32.mrb[9].mxu1 }
 0x26a   : > { %v2052_v37 = vpop.eup %2051  ;;  %v1337_v38 = vadd.f32 1.0, %v2050_v34  ;;  %2063 = vpow2.f32 %v1223_v32  ;;  %v1009_v39 = vadd.f32 %v1008_v36, %v2816_v63  ;;  %v1010_v40 = vpop.f32.mrb[10].mxu1 }
 0x26b   : > { %v2054_v41 = vpop.eup %2053  ;;  %v1338_v42 = vadd.f32 1.0, %v2052_v37  ;;  %v1153_v43 = vsub.f32 0.0, %v1007_v35  ;;  %v1011_v44 = vadd.f32 %v1010_v40, %v2814_v62  ;;  %v1012_v2 = vpop.f32.mrb[11].mxu1 }
 0x26c   : > { %v2056_v45 = vpop.eup %2055  ;;  %2065 = vrcp.f32 %v1337_v38  ;;  %v1339_v46 = vadd.f32 1.0, %v2054_v41  ;;  %v1154_v47 = vsub.f32 0.0, %v1009_v39  ;;  %v1013_v48 = vadd.f32 %v1012_v2, %v2816_v63 }
 0x26d   : > { %2067 = vrcp.f32 %v1338_v42  ;;  %v1340_v49 = vadd.f32 1.0, %v2056_v45  ;;  %v1225_v50 = vmul.f32 1.442695, %v1153_v43  ;;  %v1155_v51 = vsub.f32 0.0, %v1011_v44 }
 0x26e   : > { %2069 = vrcp.f32 %v1339_v46  ;;  %v1227_v52 = vmul.f32 1.442695, %v1154_v47  ;;  %v1156_v53 = vsub.f32 0.0, %v1013_v48 }
 0x26f   : > { %2071 = vrcp.f32 %v1340_v49  ;;  %v1229_v54 = vmul.f32 1.442695, %v1155_v51 }
 0x270   : > { %2073 = vpow2.f32 %v1225_v50  ;;  %v1231_v55 = vmul.f32 1.442695, %v1156_v53  ;;  %v1016_v56 = vpop.f32.mrb[12].mxu1 }
 0x271   : > { %v2058_v57 = vpop.eup %2057  ;;  %2075 = vpow2.f32 %v1227_v52  ;;  %v1017_v58 = vadd.f32 %v1016_v56, %v2814_v62  ;;  %v1018_v59 = vpop.f32.mrb[13].mxu1 }
 0x272   : > { %v2060_v60 = vpop.eup %2059  ;;  %v1341_v61 = vadd.f32 1.0, %v2058_v57  ;;  %2077 = vpow2.f32 %v1229_v54  ;;  %v1019_v1 = vadd.f32 %v1018_v59, %v2816_v63  ;;  %v1020_v3 = vpop.f32.mrb[14].mxu1 }
 0x273   : > { %v2062_v0 = vpop.eup %2061  ;;  %v1342_v4 = vadd.f32 1.0, %v2060_v60  ;;  %2079 = vpow2.f32 %v1231_v55  ;;  %v1157_v5 = vsub.f32 0.0, %v1017_v58  ;;  %v1021_v6 = vadd.f32 %v1020_v3, %v2814_v62  ;;  %v1022_v7 = vpop.f32.mrb[15].mxu1 }
 0x274   : > { %v2064_v8 = vpop.eup %2063  ;;  %2081 = vrcp.f32 %v1341_v61  ;;  %v1343_v9 = vadd.f32 1.0, %v2062_v0  ;;  %v1158_v10 = vsub.f32 0.0, %v1019_v1  ;;  %v1023_v11 = vadd.f32 %v1022_v7, %v2816_v63 }
 0x275   : > { %2083 = vrcp.f32 %v1342_v4  ;;  %v1344_v12 = vadd.f32 1.0, %v2064_v8  ;;  %v1233_v13 = vmul.f32 1.442695, %v1157_v5  ;;  %v1159_v14 = vsub.f32 0.0, %v1021_v6 }
 0x276   : > { %v2066_v15 = vpop.eup %2065  ;;  %2085 = vrcp.f32 %v1343_v9  ;;  %v1235_v16 = vmul.f32 1.442695, %v1158_v10  ;;  %v1160_v17 = vsub.f32 0.0, %v1023_v11 }
 0x277   : > { %v2068_v18 = vpop.eup %2067  ;;  %1465 = vst [vmem:[%s2836_s12] sm:$0xff] %v2066_v15  ;;  %2087 = vrcp.f32 %v1344_v12  ;;  %v1237_v19 = vmul.f32 1.442695, %v1159_v14 }
 0x278   : > { %v2070_v20 = vpop.eup %2069  ;;  %1466 = vst [vmem:[%s2836_s12 + $0x8] sm:$0xff] %v2068_v18  ;;  %2089 = vpow2.f32 %v1233_v13  ;;  %v1239_v21 = vmul.f32 1.442695, %v1160_v17  ;;  %v1026_v22 = vpop.f32.mrb[16].mxu1 }
 0x279   : > { %v2072_v23 = vpop.eup %2071  ;;  %1467 = vst [vmem:[%s2836_s12 + $0x10] sm:$0xff] %v2070_v20  ;;  %2091 = vpow2.f32 %v1235_v16  ;;  %v1027_v24 = vadd.f32 %v1026_v22, %v2814_v62  ;;  %v1028_v25 = vpop.f32.mrb[17].mxu1 }
 0x27a   : > { %v2074_v26 = vpop.eup %2073  ;;  %1468 = vst [vmem:[%s2836_s12 + $0x18] sm:$0xff] %v2072_v23  ;;  %2093 = vpow2.f32 %v1237_v19  ;;  %v1029_v27 = vadd.f32 %v1028_v25, %v2816_v63  ;;  %v1030_v28 = vpop.f32.mrb[18].mxu1 }
 0x27b   : > { %v2076_v29 = vpop.eup %2075  ;;  %v1345_v30 = vadd.f32 1.0, %v2074_v26  ;;  %2095 = vpow2.f32 %v1239_v21  ;;  %v1161_v31 = vsub.f32 0.0, %v1027_v24  ;;  %v1031_v32 = vadd.f32 %v1030_v28, %v2814_v62  ;;  %v1032_v33 = vpop.f32.mrb[19].mxu1 }
 0x27c   : > { %v2078_v34 = vpop.eup %2077  ;;  %v1346_v35 = vadd.f32 1.0, %v2076_v29  ;;  %v1162_v36 = vsub.f32 0.0, %v1029_v27  ;;  %v1033_v37 = vadd.f32 %v1032_v33, %v2816_v63 }
 0x27d   : > { %v2080_v38 = vpop.eup %2079  ;;  %2097 = vrcp.f32 %v1345_v30  ;;  %v1347_v39 = vadd.f32 1.0, %v2078_v34  ;;  %v1241_v40 = vmul.f32 1.442695, %v1161_v31  ;;  %v1163_v41 = vsub.f32 0.0, %v1031_v32 }
 0x27e   : > { %v2082_v42 = vpop.eup %2081  ;;  %2099 = vrcp.f32 %v1346_v35  ;;  %v1348_v43 = vadd.f32 1.0, %v2080_v38  ;;  %v1243_v44 = vmul.f32 1.442695, %v1162_v36  ;;  %v1164_v2 = vsub.f32 0.0, %v1033_v37 }
 0x27f   : > { %v2084_v45 = vpop.eup %2083  ;;  %1469 = vst [vmem:[%s2836_s12 + $0x20] sm:$0xff] %v2082_v42  ;;  %2101 = vrcp.f32 %v1347_v39  ;;  %v1245_v46 = vmul.f32 1.442695, %v1163_v41 }
 0x280   : > { %v2086_v47 = vpop.eup %2085  ;;  %1470 = vst [vmem:[%s2836_s12 + $0x28] sm:$0xff] %v2084_v45  ;;  %2103 = vrcp.f32 %v1348_v43  ;;  %v1247_v48 = vmul.f32 1.442695, %v1164_v2  ;;  %v1036_v49 = vpop.f32.mrb[20].mxu1 }
 0x281   : > { %v2088_v50 = vpop.eup %2087  ;;  %1471 = vst [vmem:[%s2836_s12 + $0x30] sm:$0xff] %v2086_v47  ;;  %2105 = vpow2.f32 %v1241_v40  ;;  %v1037_v51 = vadd.f32 %v1036_v49, %v2814_v62  ;;  %v1038_v52 = vpop.f32.mrb[21].mxu1 }
 0x282   : > { %v2090_v53 = vpop.eup %2089  ;;  %1472 = vst [vmem:[%s2836_s12 + $0x38] sm:$0xff] %v2088_v50  ;;  %2107 = vpow2.f32 %v1243_v44  ;;  %v1039_v54 = vadd.f32 %v1038_v52, %v2816_v63  ;;  %v1040_v55 = vpop.f32.mrb[22].mxu1 }
 0x283   : > { %v2092_v56 = vpop.eup %2091  ;;  %v1349_v57 = vadd.f32 1.0, %v2090_v53  ;;  %2109 = vpow2.f32 %v1245_v46  ;;  %v1165_v58 = vsub.f32 0.0, %v1037_v51  ;;  %v1041_v59 = vadd.f32 %v1040_v55, %v2814_v62  ;;  %v1042_v60 = vpop.f32.mrb[23].mxu1 }
 0x284   : > { %v2094_v61 = vpop.eup %2093  ;;  %v1350_v1 = vadd.f32 1.0, %v2092_v56  ;;  %2111 = vpow2.f32 %v1247_v48  ;;  %v1166_v3 = vsub.f32 0.0, %v1039_v54  ;;  %v1043_v0 = vadd.f32 %v1042_v60, %v2816_v63 }
 0x285   : > { %v2096_v4 = vpop.eup %2095  ;;  %2113 = vrcp.f32 %v1349_v57  ;;  %v1351_v5 = vadd.f32 1.0, %v2094_v61  ;;  %v1249_v6 = vmul.f32 1.442695, %v1165_v58  ;;  %v1167_v7 = vsub.f32 0.0, %v1041_v59 }
 0x286   : > { %2115 = vrcp.f32 %v1350_v1  ;;  %v1352_v8 = vadd.f32 1.0, %v2096_v4  ;;  %v1251_v9 = vmul.f32 1.442695, %v1166_v3  ;;  %v1168_v10 = vsub.f32 0.0, %v1043_v0 }
 0x287   : > { %v2098_v11 = vpop.eup %2097  ;;  %2117 = vrcp.f32 %v1351_v5  ;;  %v1253_v12 = vmul.f32 1.442695, %v1167_v7 }
 0x288   : > { %v2100_v13 = vpop.eup %2099  ;;  %1473 = vst [vmem:[%s2836_s12 + $0x40] sm:$0xff] %v2098_v11  ;;  %2119 = vrcp.f32 %v1352_v8  ;;  %v1255_v14 = vmul.f32 1.442695, %v1168_v10  ;;  %v1046_v15 = vpop.f32.mrb[24].mxu1 }
 0x289   : > { %v2102_v16 = vpop.eup %2101  ;;  %1474 = vst [vmem:[%s2836_s12 + $0x48] sm:$0xff] %v2100_v13  ;;  %2121 = vpow2.f32 %v1249_v6  ;;  %v1047_v17 = vadd.f32 %v1046_v15, %v2814_v62  ;;  %v1048_v18 = vpop.f32.mrb[25].mxu1 }
 0x28a   : > { %v2104_v19 = vpop.eup %2103  ;;  %1475 = vst [vmem:[%s2836_s12 + $0x50] sm:$0xff] %v2102_v16  ;;  %2123 = vpow2.f32 %v1251_v9  ;;  %v1049_v20 = vadd.f32 %v1048_v18, %v2816_v63  ;;  %v1050_v21 = vpop.f32.mrb[26].mxu1 }
 0x28b   : > { %v2106_v22 = vpop.eup %2105  ;;  %1476 = vst [vmem:[%s2836_s12 + $0x58] sm:$0xff] %v2104_v19  ;;  %2125 = vpow2.f32 %v1253_v12  ;;  %v1169_v23 = vsub.f32 0.0, %v1047_v17  ;;  %v1051_v24 = vadd.f32 %v1050_v21, %v2814_v62  ;;  %v1052_v25 = vpop.f32.mrb[27].mxu1 }
 0x28c   : > { %v2108_v26 = vpop.eup %2107  ;;  %v1353_v27 = vadd.f32 1.0, %v2106_v22  ;;  %2127 = vpow2.f32 %v1255_v14  ;;  %v1170_v28 = vsub.f32 0.0, %v1049_v20  ;;  %v1053_v29 = vadd.f32 %v1052_v25, %v2816_v63 }
 0x28d   : > { %v2110_v30 = vpop.eup %2109  ;;  %v1354_v31 = vadd.f32 1.0, %v2108_v26  ;;  %v1171_v32 = vsub.f32 0.0, %v1051_v24  ;;  %v1257_v35 = vmul.f32 1.442695, %v1169_v23 }
 0x28e   : > { %v2112_v33 = vpop.eup %2111  ;;  %2129 = vrcp.f32 %v1353_v27  ;;  %v1355_v34 = vadd.f32 1.0, %v2110_v30  ;;  %v1172_v36 = vsub.f32 0.0, %v1053_v29  ;;  %v1259_v39 = vmul.f32 1.442695, %v1170_v28 }
 0x28f   : > { %v2114_v37 = vpop.eup %2113  ;;  %2131 = vrcp.f32 %v1354_v31  ;;  %v1356_v38 = vadd.f32 1.0, %v2112_v33  ;;  %v1261_v41 = vmul.f32 1.442695, %v1171_v32 }
 0x290   : > { %v2116_v40 = vpop.eup %2115  ;;  %1477 = vst [vmem:[%s2836_s12 + $0x60] sm:$0xff] %v2114_v37  ;;  %2133 = vrcp.f32 %v1355_v34  ;;  %v1056_v42 = vpop.f32.mrb[28].mxu1  ;;  %v1263_v44 = vmul.f32 1.442695, %v1172_v36 }
 0x291   : > { %v2118_v43 = vpop.eup %2117  ;;  %1478 = vst [vmem:[%s2836_s12 + $0x68] sm:$0xff] %v2116_v40  ;;  %2135 = vrcp.f32 %v1356_v38  ;;  %v1057_v2 = vadd.f32 %v1056_v42, %v2814_v62  ;;  %v1058_v45 = vpop.f32.mrb[29].mxu1 }
 0x292   : > { %v2120_v46 = vpop.eup %2119  ;;  %1479 = vst [vmem:[%s2836_s12 + $0x70] sm:$0xff] %v2118_v43  ;;  %2137 = vpow2.f32 %v1257_v35  ;;  %v1059_v47 = vadd.f32 %v1058_v45, %v2816_v63  ;;  %v1060_v48 = vpop.f32.mrb[30].mxu1 }
 0x293   : > { %v2122_v49 = vpop.eup %2121  ;;  %1480 = vst [vmem:[%s2836_s12 + $0x78] sm:$0xff] %v2120_v46  ;;  %2139 = vpow2.f32 %v1259_v39  ;;  %v1173_v50 = vsub.f32 0.0, %v1057_v2  ;;  %v1061_v51 = vadd.f32 %v1060_v48, %v2814_v62  ;;  %v1062_v52 = vpop.f32.mrb[31].mxu1 }
 0x294   : > { %v2124_v53 = vpop.eup %2123  ;;  %v1357_v54 = vadd.f32 1.0, %v2122_v49  ;;  %2141 = vpow2.f32 %v1261_v41  ;;  %v1174_v55 = vsub.f32 0.0, %v1059_v47  ;;  %v1063_v56 = vadd.f32 %v1062_v52, %v2816_v63 }
 0x295   : > { %v2126_v57 = vpop.eup %2125  ;;  %v1358_v58 = vadd.f32 1.0, %v2124_v53  ;;  %2143 = vpow2.f32 %v1263_v44  ;;  %v1175_v59 = vsub.f32 0.0, %v1061_v51  ;;  %v1265_v1 = vmul.f32 1.442695, %v1173_v50 }
 0x296   : > { %v2128_v60 = vpop.eup %2127  ;;  %2145 = vrcp.f32 %v1357_v54  ;;  %v1359_v61 = vadd.f32 1.0, %v2126_v57  ;;  %v1176_v3 = vsub.f32 0.0, %v1063_v56  ;;  %v1267_v4 = vmul.f32 1.442695, %v1174_v55 }
 0x297   : > { %2147 = vrcp.f32 %v1358_v58  ;;  %v1360_v0 = vadd.f32 1.0, %v2128_v60  ;;  %v1269_v6 = vmul.f32 1.442695, %v1175_v59 }
 0x298   : > { %v2130_v5 = vpop.eup %2129  ;;  %2149 = vrcp.f32 %v1359_v61  ;;  %v1066_v7 = vpop.f32.mrb[32].mxu1  ;;  %v1271_v9 = vmul.f32 1.442695, %v1176_v3 }
 0x299   : > { %v2132_v8 = vpop.eup %2131  ;;  %1481 = vst [vmem:[%s2836_s12 + $0x80] sm:$0xff] %v2130_v5  ;;  %2151 = vrcp.f32 %v1360_v0  ;;  %v1067_v10 = vadd.f32 %v1066_v7, %v2814_v62  ;;  %v1068_v11 = vpop.f32.mrb[33].mxu1 }
 0x29a   : > { %v2134_v12 = vpop.eup %2133  ;;  %1482 = vst [vmem:[%s2836_s12 + $0x88] sm:$0xff] %v2132_v8  ;;  %2153 = vpow2.f32 %v1265_v1  ;;  %v1069_v13 = vadd.f32 %v1068_v11, %v2816_v63  ;;  %v1070_v14 = vpop.f32.mrb[34].mxu1 }
 0x29b   : > { %v2136_v15 = vpop.eup %2135  ;;  %1483 = vst [vmem:[%s2836_s12 + $0x90] sm:$0xff] %v2134_v12  ;;  %2155 = vpow2.f32 %v1267_v4  ;;  %v1177_v16 = vsub.f32 0.0, %v1067_v10  ;;  %v1071_v17 = vadd.f32 %v1070_v14, %v2814_v62  ;;  %v1072_v18 = vpop.f32.mrb[35].mxu1 }
 0x29c   : > { %v2138_v19 = vpop.eup %2137  ;;  %1484 = vst [vmem:[%s2836_s12 + $0x98] sm:$0xff] %v2136_v15  ;;  %2157 = vpow2.f32 %v1269_v6  ;;  %v1178_v20 = vsub.f32 0.0, %v1069_v13  ;;  %v1073_v21 = vadd.f32 %v1072_v18, %v2816_v63 }
 0x29d   : > { %v2140_v22 = vpop.eup %2139  ;;  %v1361_v23 = vadd.f32 1.0, %v2138_v19  ;;  %2159 = vpow2.f32 %v1271_v9  ;;  %v1179_v24 = vsub.f32 0.0, %v1071_v17  ;;  %v1273_v30 = vmul.f32 1.442695, %v1177_v16 }
 0x29e   : > { %v2142_v25 = vpop.eup %2141  ;;  %v1362_v26 = vadd.f32 1.0, %v2140_v22  ;;  %v1180_v27 = vsub.f32 0.0, %v1073_v21  ;;  %v1275_v33 = vmul.f32 1.442695, %v1178_v20 }
 0x29f   : > { %v2144_v28 = vpop.eup %2143  ;;  %2161 = vrcp.f32 %v1361_v23  ;;  %v1363_v29 = vadd.f32 1.0, %v2142_v25  ;;  %v1277_v36 = vmul.f32 1.442695, %v1179_v24 }
 0x2a0   : > { %v2146_v31 = vpop.eup %2145  ;;  %2163 = vrcp.f32 %v1362_v26  ;;  %v1364_v32 = vadd.f32 1.0, %v2144_v28  ;;  %v1076_v34 = vpop.f32.mrb[36].mxu1  ;;  %v1279_v40 = vmul.f32 1.442695, %v1180_v27 }
 0x2a1   : > { %v2148_v35 = vpop.eup %2147  ;;  %1485 = vst [vmem:[%s2836_s12 + $0xa0] sm:$0xff] %v2146_v31  ;;  %2165 = vrcp.f32 %v1363_v29  ;;  %v1077_v37 = vadd.f32 %v1076_v34, %v2814_v62  ;;  %v1078_v38 = vpop.f32.mrb[37].mxu1 }
 0x2a2   : > { %v2150_v39 = vpop.eup %2149  ;;  %1486 = vst [vmem:[%s2836_s12 + $0xa8] sm:$0xff] %v2148_v35  ;;  %2167 = vrcp.f32 %v1364_v32  ;;  %v1079_v41 = vadd.f32 %v1078_v38, %v2816_v63  ;;  %v1080_v42 = vpop.f32.mrb[38].mxu1 }
 0x2a3   : > { %v2152_v43 = vpop.eup %2151  ;;  %1487 = vst [vmem:[%s2836_s12 + $0xb0] sm:$0xff] %v2150_v39  ;;  %2169 = vpow2.f32 %v1273_v30  ;;  %v1181_v44 = vsub.f32 0.0, %v1077_v37  ;;  %v1081_v2 = vadd.f32 %v1080_v42, %v2814_v62  ;;  %v1082_v45 = vpop.f32.mrb[39].mxu1 }
 0x2a4   : > { %v2154_v46 = vpop.eup %2153  ;;  %1488 = vst [vmem:[%s2836_s12 + $0xb8] sm:$0xff] %v2152_v43  ;;  %2171 = vpow2.f32 %v1275_v33  ;;  %v1182_v47 = vsub.f32 0.0, %v1079_v41  ;;  %v1083_v48 = vadd.f32 %v1082_v45, %v2816_v63 }
 0x2a5   : > { %v2156_v49 = vpop.eup %2155  ;;  %v1365_v50 = vadd.f32 1.0, %v2154_v46  ;;  %2173 = vpow2.f32 %v1277_v36  ;;  %v1183_v51 = vsub.f32 0.0, %v1081_v2  ;;  %v1281_v57 = vmul.f32 1.442695, %v1181_v44 }
 0x2a6   : > { %v2158_v52 = vpop.eup %2157  ;;  %v1366_v53 = vadd.f32 1.0, %v2156_v49  ;;  %2175 = vpow2.f32 %v1279_v40  ;;  %v1184_v54 = vsub.f32 0.0, %v1083_v48  ;;  %v1283_v59 = vmul.f32 1.442695, %v1182_v47 }
 0x2a7   : > { %v2160_v55 = vpop.eup %2159  ;;  %2177 = vrcp.f32 %v1365_v50  ;;  %v1367_v56 = vadd.f32 1.0, %v2158_v52  ;;  %v1285_v1 = vmul.f32 1.442695, %v1183_v51 }
 0x2a8   : > { %2179 = vrcp.f32 %v1366_v53  ;;  %v1368_v58 = vadd.f32 1.0, %v2160_v55  ;;  %v1086_v60 = vpop.f32.mrb[40].mxu1  ;;  %v1287_v5 = vmul.f32 1.442695, %v1184_v54 }
 0x2a9   : > { %v2162_v61 = vpop.eup %2161  ;;  %2181 = vrcp.f32 %v1367_v56  ;;  %v1087_v3 = vadd.f32 %v1086_v60, %v2814_v62  ;;  %v1088_v0 = vpop.f32.mrb[41].mxu1 }
 0x2aa   : > { %v2164_v4 = vpop.eup %2163  ;;  %1489 = vst [vmem:[%s2836_s12 + $0xc0] sm:$0xff] %v2162_v61  ;;  %2183 = vrcp.f32 %v1368_v58  ;;  %v1089_v6 = vadd.f32 %v1088_v0, %v2816_v63  ;;  %v1090_v7 = vpop.f32.mrb[42].mxu1 }
 0x2ab   : > { %v2166_v8 = vpop.eup %2165  ;;  %1490 = vst [vmem:[%s2836_s12 + $0xc8] sm:$0xff] %v2164_v4  ;;  %2185 = vpow2.f32 %v1281_v57  ;;  %v1185_v9 = vsub.f32 0.0, %v1087_v3  ;;  %v1091_v10 = vadd.f32 %v1090_v7, %v2814_v62  ;;  %v1092_v11 = vpop.f32.mrb[43].mxu1 }
 0x2ac   : > { %v2168_v12 = vpop.eup %2167  ;;  %1491 = vst [vmem:[%s2836_s12 + $0xd0] sm:$0xff] %v2166_v8  ;;  %2187 = vpow2.f32 %v1283_v59  ;;  %v1186_v13 = vsub.f32 0.0, %v1089_v6  ;;  %v1093_v14 = vadd.f32 %v1092_v11, %v2816_v63 }
 0x2ad   : > { %v2170_v15 = vpop.eup %2169  ;;  %1492 = vst [vmem:[%s2836_s12 + $0xd8] sm:$0xff] %v2168_v12  ;;  %2189 = vpow2.f32 %v1285_v1  ;;  %v1289_v16 = vmul.f32 1.442695, %v1185_v9  ;;  %v1187_v17 = vsub.f32 0.0, %v1091_v10 }
 0x2ae   : > { %v2172_v18 = vpop.eup %2171  ;;  %v1369_v19 = vadd.f32 1.0, %v2170_v15  ;;  %2191 = vpow2.f32 %v1287_v5  ;;  %v1188_v20 = vsub.f32 0.0, %v1093_v14  ;;  %v1291_v25 = vmul.f32 1.442695, %v1186_v13 }
 0x2af   : > { %v2174_v21 = vpop.eup %2173  ;;  %v1370_v22 = vadd.f32 1.0, %v2172_v18  ;;  %2193 = vpow2.f32 %v1289_v16  ;;  %v1293_v29 = vmul.f32 1.442695, %v1187_v17 }
 0x2b0   : > { %v2176_v23 = vpop.eup %2175  ;;  %2195 = vrcp.f32 %v1369_v19  ;;  %v1371_v24 = vadd.f32 1.0, %v2174_v21  ;;  %v1096_v26 = vpop.f32.mrb[44].mxu1  ;;  %v1295_v33 = vmul.f32 1.442695, %v1188_v20 }
 0x2b1   : > { %v2178_v27 = vpop.eup %2177  ;;  %2197 = vrcp.f32 %v1370_v22  ;;  %v1372_v28 = vadd.f32 1.0, %v2176_v23  ;;  %v1097_v30 = vadd.f32 %v1096_v26, %v2814_v62  ;;  %v1098_v31 = vpop.f32.mrb[45].mxu1 }
 0x2b2   : > { %v2180_v32 = vpop.eup %2179  ;;  %1493 = vst [vmem:[%s2836_s12 + $0xe0] sm:$0xff] %v2178_v27  ;;  %2199 = vrcp.f32 %v1371_v24  ;;  %v1099_v34 = vadd.f32 %v1098_v31, %v2816_v63  ;;  %v1100_v35 = vpop.f32.mrb[46].mxu1 }
 0x2b3   : > { %v2182_v36 = vpop.eup %2181  ;;  %1494 = vst [vmem:[%s2836_s12 + $0xe8] sm:$0xff] %v2180_v32  ;;  %2201 = vrcp.f32 %v1372_v28  ;;  %v1189_v37 = vsub.f32 0.0, %v1097_v30  ;;  %v1101_v38 = vadd.f32 %v1100_v35, %v2814_v62  ;;  %v1102_v39 = vpop.f32.mrb[47].mxu1 }
 0x2b4   : > { %v2184_v40 = vpop.eup %2183  ;;  %1495 = vst [vmem:[%s2836_s12 + $0xf0] sm:$0xff] %v2182_v36  ;;  %2203 = vpow2.f32 %v1291_v25  ;;  %v1103_v41 = vadd.f32 %v1102_v39, %v2816_v63  ;;  %v1190_v44 = vsub.f32 0.0, %v1099_v34 }
 0x2b5   : > { %v2186_v42 = vpop.eup %2185  ;;  %1496 = vst [vmem:[%s2836_s12 + $0xf8] sm:$0xff] %v2184_v40  ;;  %2205 = vpow2.f32 %v1293_v29  ;;  %v1297_v43 = vmul.f32 1.442695, %v1189_v37  ;;  %v1191_v46 = vsub.f32 0.0, %v1101_v38 }
 0x2b6   : > { %v2188_v2 = vpop.eup %2187  ;;  %v1373_v45 = vadd.f32 1.0, %v2186_v42  ;;  %2207 = vpow2.f32 %v1295_v33  ;;  %v1192_v49 = vsub.f32 0.0, %v1103_v41  ;;  %v1299_v55 = vmul.f32 1.442695, %v1190_v44 }
 0x2b7   : > { %v2190_v47 = vpop.eup %2189  ;;  %v1374_v48 = vadd.f32 1.0, %v2188_v2  ;;  %2209 = vpow2.f32 %v1297_v43  ;;  %v1301_v60 = vmul.f32 1.442695, %v1191_v46 }
 0x2b8   : > { %v2192_v50 = vpop.eup %2191  ;;  %2211 = vrcp.f32 %v1373_v45  ;;  %v1375_v51 = vadd.f32 1.0, %v2190_v47  ;;  %v1106_v52 = vpop.f32.mrb[48].mxu1  ;;  %v1303_v0 = vmul.f32 1.442695, %v1192_v49 }
 0x2b9   : > { %v2194_v53 = vpop.eup %2193  ;;  %2213 = vrcp.f32 %v1374_v48  ;;  %v1376_v54 = vadd.f32 1.0, %v2192_v50  ;;  %v1107_v56 = vadd.f32 %v1106_v52, %v2814_v62  ;;  %v1108_v57 = vpop.f32.mrb[49].mxu1 }
 0x2ba   : > { %v2196_v58 = vpop.eup %2195  ;;  %2215 = vrcp.f32 %v1375_v51  ;;  %v1377_v59 = vadd.f32 1.0, %v2194_v53  ;;  %v1109_v61 = vadd.f32 %v1108_v57, %v2816_v63  ;;  %v1110_v1 = vpop.f32.mrb[50].mxu1 }
 0x2bb   : > { %v2198_v3 = vpop.eup %2197  ;;  %1497 = vst [vmem:[%s2836_s12 + $0x100] sm:$0xff] %v2196_v58  ;;  %2217 = vrcp.f32 %v1376_v54  ;;  %v1193_v4 = vsub.f32 0.0, %v1107_v56  ;;  %v1111_v5 = vadd.f32 %v1110_v1, %v2814_v62  ;;  %v1112_v6 = vpop.f32.mrb[51].mxu1 }
 0x2bc   : > { %v2200_v7 = vpop.eup %2199  ;;  %1498 = vst [vmem:[%s2836_s12 + $0x108] sm:$0xff] %v2198_v3  ;;  %2219 = vrcp.f32 %v1377_v59  ;;  %v1113_v8 = vadd.f32 %v1112_v6, %v2816_v63  ;;  %v1194_v11 = vsub.f32 0.0, %v1109_v61 }
 0x2bd   : > { %v2202_v9 = vpop.eup %2201  ;;  %1499 = vst [vmem:[%s2836_s12 + $0x110] sm:$0xff] %v2200_v7  ;;  %2221 = vpow2.f32 %v1299_v55  ;;  %v1305_v10 = vmul.f32 1.442695, %v1193_v4  ;;  %v1195_v13 = vsub.f32 0.0, %v1111_v5 }
 0x2be   : > { %v2204_v12 = vpop.eup %2203  ;;  %1500 = vst [vmem:[%s2836_s12 + $0x118] sm:$0xff] %v2202_v9  ;;  %2223 = vpow2.f32 %v1301_v60  ;;  %v1196_v16 = vsub.f32 0.0, %v1113_v8  ;;  %v1307_v22 = vmul.f32 1.442695, %v1194_v11 }
 0x2bf   : > { %v2206_v14 = vpop.eup %2205  ;;  %v1378_v15 = vadd.f32 1.0, %v2204_v12  ;;  %2225 = vpow2.f32 %v1303_v0  ;;  %v1309_v27 = vmul.f32 1.442695, %v1195_v13 }
 0x2c0   : > { %v2208_v17 = vpop.eup %2207  ;;  %v1379_v18 = vadd.f32 1.0, %v2206_v14  ;;  %2227 = vpow2.f32 %v1305_v10  ;;  %v1116_v19 = vpop.f32.mrb[52].mxu1  ;;  %v1311_v31 = vmul.f32 1.442695, %v1196_v16 }
 0x2c1   : > { %v2210_v20 = vpop.eup %2209  ;;  %2229 = vrcp.f32 %v1378_v15  ;;  %v1380_v21 = vadd.f32 1.0, %v2208_v17  ;;  %v1117_v23 = vadd.f32 %v1116_v19, %v2814_v62  ;;  %v1118_v24 = vpop.f32.mrb[53].mxu1 }
 0x2c2   : > { %v2212_v25 = vpop.eup %2211  ;;  %2231 = vrcp.f32 %v1379_v18  ;;  %v1381_v26 = vadd.f32 1.0, %v2210_v20  ;;  %v1119_v28 = vadd.f32 %v1118_v24, %v2816_v63  ;;  %v1120_v29 = vpop.f32.mrb[54].mxu1 }
 0x2c3   : > { %v2214_v30 = vpop.eup %2213  ;;  %1501 = vst [vmem:[%s2836_s12 + $0x120] sm:$0xff] %v2212_v25  ;;  %2233 = vrcp.f32 %v1380_v21  ;;  %v1197_v32 = vsub.f32 0.0, %v1117_v23  ;;  %v1121_v33 = vadd.f32 %v1120_v29, %v2814_v62  ;;  %v1122_v34 = vpop.f32.mrb[55].mxu1 }
 0x2c4   : > { %v2216_v35 = vpop.eup %2215  ;;  %1502 = vst [vmem:[%s2836_s12 + $0x128] sm:$0xff] %v2214_v30  ;;  %2235 = vrcp.f32 %v1381_v26  ;;  %v1198_v36 = vsub.f32 0.0, %v1119_v28  ;;  %v1123_v37 = vadd.f32 %v1122_v34, %v2816_v63 }
 0x2c5   : > { %v2218_v38 = vpop.eup %2217  ;;  %1503 = vst [vmem:[%s2836_s12 + $0x130] sm:$0xff] %v2216_v35  ;;  %2237 = vpow2.f32 %v1307_v22  ;;  %v1313_v39 = vmul.f32 1.442695, %v1197_v32  ;;  %v1199_v40 = vsub.f32 0.0, %v1121_v33 }
 0x2c6   : > { %v2220_v41 = vpop.eup %2219  ;;  %1504 = vst [vmem:[%s2836_s12 + $0x138] sm:$0xff] %v2218_v38  ;;  %2239 = vpow2.f32 %v1309_v27  ;;  %v1315_v42 = vmul.f32 1.442695, %v1198_v36  ;;  %v1200_v43 = vsub.f32 0.0, %v1123_v37 }
 0x2c7   : > { %v2222_v44 = vpop.eup %2221  ;;  %1505 = vst [vmem:[%s2836_s12 + $0x140] sm:$0xff] %v2220_v41  ;;  %2241 = vpow2.f32 %v1311_v31  ;;  %v1317_v49 = vmul.f32 1.442695, %v1199_v40 }
 0x2c8   : > { %v2224_v2 = vpop.eup %2223  ;;  %v1382_v45 = vadd.f32 1.0, %v2222_v44  ;;  %2243 = vpow2.f32 %v1313_v39  ;;  %v1126_v46 = vpop.f32.mrb[56].mxu1  ;;  %v1319_v54 = vmul.f32 1.442695, %v1200_v43 }
 0x2c9   : > { %v2226_v47 = vpop.eup %2225  ;;  %v1383_v48 = vadd.f32 1.0, %v2224_v2  ;;  %2245 = vpow2.f32 %v1315_v42  ;;  %v1127_v50 = vadd.f32 %v1126_v46, %v2814_v62  ;;  %v1128_v51 = vpop.f32.mrb[57].mxu1 }
 0x2ca   : > { %v2228_v52 = vpop.eup %2227  ;;  %2247 = vrcp.f32 %v1382_v45  ;;  %v1384_v53 = vadd.f32 1.0, %v2226_v47  ;;  %v1129_v55 = vadd.f32 %v1128_v51, %v2816_v63  ;;  %v1130_v56 = vpop.f32.mrb[58].mxu1 }
 0x2cb   : > { %v2230_v57 = vpop.eup %2229  ;;  %2249 = vrcp.f32 %v1383_v48  ;;  %v1385_v58 = vadd.f32 1.0, %v2228_v52  ;;  %v1201_v59 = vsub.f32 0.0, %v1127_v50  ;;  %v1131_v60 = vadd.f32 %v1130_v56, %v2814_v62  ;;  %v1132_v61 = vpop.f32.mrb[59].mxu1 }
 0x2cc   : > { %v2232_v1 = vpop.eup %2231  ;;  %1506 = vst [vmem:[%s2836_s12 + $0x148] sm:$0xff] %v2230_v57  ;;  %2251 = vrcp.f32 %v1384_v53  ;;  %v1202_v3 = vsub.f32 0.0, %v1129_v55  ;;  %v1133_v0 = vadd.f32 %v1132_v61, %v2816_v63 }
 0x2cd   : > { %v2234_v4 = vpop.eup %2233  ;;  %1507 = vst [vmem:[%s2836_s12 + $0x150] sm:$0xff] %v2232_v1  ;;  %2253 = vrcp.f32 %v1385_v58  ;;  %v1321_v5 = vmul.f32 1.442695, %v1201_v59  ;;  %v1203_v6 = vsub.f32 0.0, %v1131_v60 }
 0x2ce   : > { %v2236_v7 = vpop.eup %2235  ;;  %1508 = vst [vmem:[%s2836_s12 + $0x158] sm:$0xff] %v2234_v4  ;;  %2255 = vpow2.f32 %v1317_v49  ;;  %v1323_v8 = vmul.f32 1.442695, %v1202_v3  ;;  %v1204_v9 = vsub.f32 0.0, %v1133_v0 }
 0x2cf   : > { %v2238_v10 = vpop.eup %2237  ;;  %1509 = vst [vmem:[%s2836_s12 + $0x160] sm:$0xff] %v2236_v7  ;;  %2257 = vpow2.f32 %v1319_v54  ;;  %v1325_v16 = vmul.f32 1.442695, %v1203_v6 }
 0x2d0   : > { %v2240_v11 = vpop.eup %2239  ;;  %v1386_v12 = vadd.f32 1.0, %v2238_v10  ;;  %2259 = vpow2.f32 %v1321_v5  ;;  %v1136_v13 = vpop.f32.mrb[60].mxu1  ;;  %v1327_v21 = vmul.f32 1.442695, %v1204_v9 }
 0x2d1   : > { %v2242_v14 = vpop.eup %2241  ;;  %v1387_v15 = vadd.f32 1.0, %v2240_v11  ;;  %2261 = vpow2.f32 %v1323_v8  ;;  %v1137_v17 = vadd.f32 %v1136_v13, %v2814_v62  ;;  %v1138_v18 = vpop.f32.mrb[61].mxu1 }
 0x2d2   : > { %v2244_v19 = vpop.eup %2243  ;;  %2263 = vrcp.f32 %v1386_v12  ;;  %v1388_v20 = vadd.f32 1.0, %v2242_v14  ;;  %v1139_v22 = vadd.f32 %v1138_v18, %v2816_v63  ;;  %v1140_v23 = vpop.f32.mrb[62].mxu1 }
 0x2d3   : > { %v2246_v24 = vpop.eup %2245  ;;  %2265 = vrcp.f32 %v1387_v15  ;;  %v1389_v25 = vadd.f32 1.0, %v2244_v19  ;;  %v1205_v26 = vsub.f32 0.0, %v1137_v17  ;;  %v1141_v27 = vadd.f32 %v1140_v23, %v2814_v62  ;;  %v1142_v28 = vpop.f32.mrb[63].mxu1 }
 0x2d4   : > { %v2248_v29 = vpop.eup %2247  ;;  %2267 = vrcp.f32 %v1388_v20  ;;  %v1390_v30 = vadd.f32 1.0, %v2246_v24  ;;  %v1206_v31 = vsub.f32 0.0, %v1139_v22  ;;  %v1143_v32 = vadd.f32 %v1142_v28, %v2816_v63 }
 0x2d5   : > { %v2250_v33 = vpop.eup %2249  ;;  %1510 = vst [vmem:[%s2836_s12 + $0x168] sm:$0xff] %v2248_v29  ;;  %2269 = vrcp.f32 %v1389_v25  ;;  %v1329_v34 = vmul.f32 1.442695, %v1205_v26  ;;  %v1207_v62 = vsub.f32 0.0, %v1141_v27 }
 0x2d6   : > { %v2252_v35 = vpop.eup %2251  ;;  %1511 = vst [vmem:[%s2836_s12 + $0x170] sm:$0xff] %v2250_v33  ;;  %2271 = vrcp.f32 %v1390_v30  ;;  %v1331_v36 = vmul.f32 1.442695, %v1206_v31  ;;  %v1208_v39 = vsub.f32 0.0, %v1143_v32 }
 0x2d7   : > { %v2254_v37 = vpop.eup %2253  ;;  %1512 = vst [vmem:[%s2836_s12 + $0x178] sm:$0xff] %v2252_v35  ;;  %2273 = vpow2.f32 %v1325_v16  ;;  %v1333_v2 = vmul.f32 1.442695, %v1207_v62 }
 0x2d8   : > { %v2256_v38 = vpop.eup %2255  ;;  %1513 = vst [vmem:[%s2836_s12 + $0x180] sm:$0xff] %v2254_v37  ;;  %2275 = vpow2.f32 %v1327_v21  ;;  %v1335_v47 = vmul.f32 1.442695, %v1208_v39 }
 0x2d9   : > { %v2258_v40 = vpop.eup %2257  ;;  %v1391_v41 = vadd.f32 1.0, %v2256_v38  ;;  %2277 = vpow2.f32 %v1329_v34 }
 0x2da   : > { %v2260_v63 = vpop.eup %2259  ;;  %v1392_v42 = vadd.f32 1.0, %v2258_v40  ;;  %2279 = vpow2.f32 %v1331_v36 }
 0x2db   : > { %v2262_v43 = vpop.eup %2261  ;;  %2281 = vrcp.f32 %v1391_v41  ;;  %v1393_v44 = vadd.f32 1.0, %v2260_v63 }
 0x2dc   : > { %v2264_v45 = vpop.eup %2263  ;;  %2283 = vrcp.f32 %v1392_v42  ;;  %v1394_v46 = vadd.f32 1.0, %v2262_v43 }
 0x2dd   : > { %v2266_v48 = vpop.eup %2265  ;;  %1514 = vst [vmem:[%s2836_s12 + $0x188] sm:$0xff] %v2264_v45  ;;  %2285 = vrcp.f32 %v1393_v44 }
 0x2de   : > { %v2268_v49 = vpop.eup %2267  ;;  %1515 = vst [vmem:[%s2836_s12 + $0x190] sm:$0xff] %v2266_v48  ;;  %2287 = vrcp.f32 %v1394_v46 }
 0x2df   : > { %v2270_v50 = vpop.eup %2269  ;;  %1516 = vst [vmem:[%s2836_s12 + $0x198] sm:$0xff] %v2268_v49  ;;  %2289 = vpow2.f32 %v1333_v2 }
 0x2e0   : > { %v2272_v51 = vpop.eup %2271  ;;  %1517 = vst [vmem:[%s2836_s12 + $0x1a0] sm:$0xff] %v2270_v50  ;;  %2291 = vpow2.f32 %v1335_v47 }
 0x2e1   : > { %v2274_v52 = vpop.eup %2273  ;;  %1518 = vst [vmem:[%s2836_s12 + $0x1a8] sm:$0xff] %v2272_v51 }
 0x2e2   : > { %v2276_v53 = vpop.eup %2275  ;;  %v1395_v54 = vadd.f32 1.0, %v2274_v52 }
 0x2e3   : > { %v2278_v55 = vpop.eup %2277  ;;  %v1396_v56 = vadd.f32 1.0, %v2276_v53 }
 0x2e4   : > { %v2280_v57 = vpop.eup %2279  ;;  %2293 = vrcp.f32 %v1395_v54  ;;  %v1397_v58 = vadd.f32 1.0, %v2278_v55 }
 0x2e5   : > { %v2282_v59 = vpop.eup %2281  ;;  %2295 = vrcp.f32 %v1396_v56  ;;  %v1398_v60 = vadd.f32 1.0, %v2280_v57 }
 0x2e6   : > { %v2284_v61 = vpop.eup %2283  ;;  %1519 = vst [vmem:[%s2836_s12 + $0x1b0] sm:$0xff] %v2282_v59  ;;  %2297 = vrcp.f32 %v1397_v58 }
 0x2e7   : > { %v2286_v1 = vpop.eup %2285  ;;  %1520 = vst [vmem:[%s2836_s12 + $0x1b8] sm:$0xff] %v2284_v61  ;;  %2299 = vrcp.f32 %v1398_v60 }
 0x2e8   : > { %v2288_v3 = vpop.eup %2287  ;;  %1521 = vst [vmem:[%s2836_s12 + $0x1c0] sm:$0xff] %v2286_v1 }
 0x2e9   : > { %v2290_v0 = vpop.eup %2289  ;;  %1522 = vst [vmem:[%s2836_s12 + $0x1c8] sm:$0xff] %v2288_v3 }
 0x2ea   : > { %v2292_v4 = vpop.eup %2291  ;;  %v1399_v5 = vadd.f32 1.0, %v2290_v0 }
 0x2eb   : > { %v1400_v6 = vadd.f32 1.0, %v2292_v4 }
 0x2ec   : > { %2301 = vrcp.f32 %v1399_v5 }
 0x2ed   : > { %2303 = vrcp.f32 %v1400_v6 }
 0x2ee   : > { %v2294_v7 = vpop.eup %2293 }
 0x2ef   : > { %v2296_v8 = vpop.eup %2295  ;;  %1523 = vst [vmem:[%s2836_s12 + $0x1d0] sm:$0xff] %v2294_v7 }
 0x2f0   : > { %v2298_v9 = vpop.eup %2297  ;;  %1524 = vst [vmem:[%s2836_s12 + $0x1d8] sm:$0xff] %v2296_v8 }
 0x2f1   : > { %v2300_v10 = vpop.eup %2299  ;;  %1525 = vst [vmem:[%s2836_s12 + $0x1e0] sm:$0xff] %v2298_v9 }
 0x2f2   : > { %1526 = vst [vmem:[%s2836_s12 + $0x1e8] sm:$0xff] %v2300_v10 }
 0x2f6   : > { %v2302_v11 = vpop.eup %2301 }
 0x2f7   : > { %v2304_v12 = vpop.eup %2303  ;;  %1527 = vst [vmem:[%s2836_s12 + $0x1f0] sm:$0xff] %v2302_v11 }
 0x2f8   : > { %1528 = vst [vmem:[%s2836_s12 + $0x1f8] sm:$0xff] %v2304_v12 }
 0x2f9   : > { %2404 = shalt.err (!%p2401_p2)
}
 0x2fa   : > { %s2405_s6 = scalar_lea.hbm %s2953_s11, 8192  ;;  %s2409_s10 = scalar_lea.hbm %s3006_s5, 16384 }
 0x2fb   : > { %p2406_p13 = scmp.ne.s32.totalorder %s2953_s11, %s2405_s6  ;;  %p2410_p4 = scmp.lt.u32.totalorder %s2953_s11, %s3006_s5 }
 0x2fc   : > { %p2411_p7 = scmp.lt.u32.totalorder %s2409_s10, %s2405_s6  ;;  %p2413_p11 = scmp.lt.u32.totalorder %s2405_s6, %s2953_s11 }
 0x2fd   : > { %p2407_p6 = pnand %p2406_p13, %p3020_p0 }
 0x2fe   : > { %p2412_p8 = por %p2411_p7, %p2410_p4 }
 0x2ff   : > { %p2408_p10 = pneg %p2407_p6 }
 0x300   : > { %p2414_p1 = por %p2413_p11, %p2412_p8 }
 0x302   : > { %p2415_p3 = pnand %p2414_p1, %p2408_p10 }
 0x304   : > { %2418 = shalt.err (!%p2415_p3)
}
 0x305   : > { %s2474_s13 = smov 256   ;;  %s2475_s8 = smov 16  }
 0x306   : > { %1815 = dma.vmem_to_hbm [thread:$0]  (%p3020_p0), %s2955_s29, 8192, %s2953_s11, %s1530_s14, %s2474_s13, %s2474_s13, %s2475_s8  }
 0x307 PF: > { %s1559_s9 = sand.u32 1, %s2449_s18   ;;  %p3021_p5 = scmp.ne.s32.totalorder %s3011_s25, 0 }
 0x308   : > { %p3022_p9 = scmp.ge.s32.totalorder %s2461_s21, 2  ;;  %s1560_s15 = scalar_lea.sflag [#allocation4], %s1559_s9 }
 0x30a   : > { %p1829_p12 = pnand %p3022_p9, %p3021_p5 }
 0x30c   : > { %2444 = dma.done.wait (!%p1829_p12), %s1560_s15, 8192  }
 0x30d   : > { %2446 = vsyncadd (!%p1829_p12), %s1560_s15, 4294959104  ;;  %p19_p2 = scmp.ge.s32.totalorder %s2616_s16, 4   ;;  %s3023_s18 = smov %s2453_s19 }
 0x30e   : > { %s3024_s19 = smov %s2457_s20  ;;  %s3025_s20 = smov %s2625_s27 }
 0x30f   : > { %s3026_s21 = smov %s2616_s16  ;;  %21 = sbr.rel (!%p19_p2) target bundleno = 6 (0x6), region = 93 }
 0x316   :  { %1565 = vsyncpa [#allocation3], 1 }
 0x317   :  { %1567 = vsyncpa [#allocation3 + $0x1], 1 }
 0x318   :  { %1568 = vsyncpa [#allocation6], 1 }
 0x319   :  { %1569 = vsyncpa [#allocation4], 1 }
 0x31a   :  { %1571 = vsyncpa [#allocation4 + $0x1], 1 }

</bundles_post_ra>
